<compile_context>
chip_gen: v7x
topology: tpu7x:2x2x1
jax: 0.10.0
libtpu: 0.0.40
codegen_flags: <defaults>
</compile_context>

<pallas_src>
import math
import jax
import jax.numpy as jnp
from jax.experimental import pallas as pl
from jax.experimental.pallas import tpu as pltpu


# ----------------------------------------------------------------------------
# small helpers
# ----------------------------------------------------------------------------
def _choose_batch_block(B, T, min_rows=128):
    """Smallest divisor Bb of B with Bb*T >= min_rows (keeps the matmul M-dim
    and output stores dense for small-T configs); falls back to B."""
    for d in range(1, B + 1):
        if B % d == 0 and d * T >= min_rows:
            return d
    return B


def _vmem_limit_bytes():
    """Per-generation VMEM limit: ~3/4 of physical (96 MiB on v5e/v6e's 128 MiB,
    48 MiB on v7x's 64 MiB) instead of a fixed 32 MiB cap."""
    try:
        cap = int(pltpu.get_tpu_info().vmem_capacity_bytes)
    except Exception:
        cap = 128 * 1024 * 1024
    return (cap * 3) // 4


_UNSET = object()
_WEIGHT_PIPELINE_MODE = _UNSET


def _probe_copy_kernel(x_ref, o_ref):
    o_ref[...] = x_ref[...]


def _weight_pipeline_mode():
    """pl.Buffered(1) single-buffers grid-invariant weights (their index_map is
    constant over the batch grid, so default double-buffering only wastes VMEM).
    Probed once with a tiny AOT compile; falls back to default buffering."""
    global _WEIGHT_PIPELINE_MODE
    if _WEIGHT_PIPELINE_MODE is _UNSET:
        try:
            spec = pl.BlockSpec((8, 128), lambda i: (0, 0),
                                pipeline_mode=pl.Buffered(1))
            probe = pl.pallas_call(
                _probe_copy_kernel,
                out_shape=jax.ShapeDtypeStruct((8, 128), jnp.float32),
                grid=(1,),
                in_specs=[spec],
                out_specs=pl.BlockSpec((8, 128), lambda i: (0, 0)),
            )
            jax.jit(probe).lower(
                jax.ShapeDtypeStruct((8, 128), jnp.float32)).compile()
            _WEIGHT_PIPELINE_MODE = pl.Buffered(1)
        except Exception:
            _WEIGHT_PIPELINE_MODE = None
    return _WEIGHT_PIPELINE_MODE


# ----------------------------------------------------------------------------
# FFT block kernel
# ----------------------------------------------------------------------------
def make_fft_block_kernel(Bb, T, d_model, d_inner, n_head, d_k, d_v, K1, P1,
                          eps=1e-5, q_chunk=None):
    D = d_model
    rows = Bb * T
    TQ = q_chunk if (q_chunk is not None and T % q_chunk == 0) else T
    n_q_chunks = T // TQ
    bf16 = jnp.bfloat16
    f32 = jnp.float32

    def layer_norm(y, g, b):
        # single-pass statistics: one fewer (rows, D) VPU pass + XLU reduction
        mu = jnp.mean(y, axis=-1, keepdims=True)
        msq = jnp.mean(y * y, axis=-1, keepdims=True)
        var = msq - mu * mu
        return (y - mu) * jax.lax.rsqrt(var + eps) * g + b

    def kernel(x_ref, bias_ref, npad_ref,
               wqkv_ref, bqkv_ref, wo_ref, bo_ref, ln1g_ref, ln1b_ref,
               w1_ref, b1_ref, w2_ref, b2_ref, ln2g_ref, ln2b_ref,
               out_ref):
        x = x_ref[...].reshape(rows, D)               # (Bb*T, D) f32
        bias = bias_ref[...]                          # (Bb, 1, T) key-pad bias
        npad = npad_ref[...].reshape(rows, 1)         # (Bb*T, 1) non-pad mask

        # ------------------ multi-head self-attention -----------------------
        # ONE fat QKV matmul; the 1/sqrt(d_k) scale is folded into the Q
        # weights and bias at init time.
        x_bf = x.astype(bf16)
        qkv = jnp.dot(x_bf, wqkv_ref[...], preferred_element_type=f32)
        qkv = (qkv + bqkv_ref[...]).reshape(Bb, T, 3 * D)

        ctx_heads = []
        for h in range(n_head):
            qh = qkv[:, :, h * d_k:(h + 1) * d_k].astype(bf16)          # (Bb,T,dk)
            kh = qkv[:, :, D + h * d_k:D + (h + 1) * d_k].astype(bf16)
            vh = qkv[:, :, 2 * D + h * d_v:2 * D + (h + 1) * d_v].astype(bf16)
            ctx_chunks = []
            for c in range(n_q_chunks):               # query chunking caps VMEM
                qc = qh[:, c * TQ:(c + 1) * TQ, :]
                s = jnp.einsum('bqd,bkd->bqk', qc, kh,
                               preferred_element_type=f32) + bias        # (Bb,TQ,T)
                m = jnp.max(s, axis=-1, keepdims=True)
                e = jnp.exp(s - m)
                p = e * pl.reciprocal(jnp.sum(e, axis=-1, keepdims=True),
                                      approx=True)
                # dropout on attention weights: identity (eval mode)
                ctx_chunks.append(jnp.einsum('bqk,bkd->bqd', p.astype(bf16), vh,
                                             preferred_element_type=f32))
            ctx_heads.append(ctx_chunks[0] if n_q_chunks == 1
                             else jnp.concatenate(ctx_chunks, axis=1))
        ctx = (ctx_heads[0] if n_head == 1
               else jnp.concatenate(ctx_heads, axis=-1)).reshape(rows, D)

        # fused output projection over ALL heads: one (rows, D) @ (D, D) matmul
        attn = jnp.dot(ctx.astype(bf16), wo_ref[...],
                       preferred_element_type=f32) + bo_ref[...]
        # dropout on fc output: identity (eval mode)

        y = layer_norm(attn + x, ln1g_ref[...], ln1b_ref[...])
        y = y * npad                                   # non_pad_mask

        # -------- position-wise FFN: Conv1d(K1) -> ReLU -> Conv1d(1) ---------
        # K1 accumulated shifted matmuls: sublane roll (XLU) + edge masking
        # instead of a K1x-duplicated im2col slab.
        if K1 > 1:
            t_iota = jax.lax.broadcasted_iota(jnp.int32, (rows, 1), 0) % T
        acc = jnp.zeros((rows, d_inner), f32)
        for kk in range(K1):
            sft = P1 - kk                              # tap kk reads y[t - sft]
            if sft == 0:
                shifted = y
            else:
                rolled = pltpu.roll(y, shift=sft % rows, axis=0)
                valid = jnp.logical_and(t_iota >= sft, t_iota < T + sft)
                shifted = jnp.where(valid, rolled, 0.0)
            acc = acc + jnp.dot(shifted.astype(bf16), w1_ref[kk],
                                preferred_element_type=f32)
        h1 = jnp.maximum(acc + b1_ref[...], 0.0)
        h2 = jnp.dot(h1.astype(bf16), w2_ref[...],
                     preferred_element_type=f32) + b2_ref[...]
        # dropout: identity (eval mode)

        z = layer_norm(h2 + y, ln2g_ref[...], ln2b_ref[...])
        z = z * npad                                   # non_pad_mask
        out_ref[...] = z.reshape(Bb, T, D).astype(out_ref.dtype)

    return kernel


def fft_block(x, attn_bias, non_pad, p, *, n_head, d_k, d_v, K1, P1):
    B, T, D = x.shape
    d_inner = p["w1"].shape[-1]
    Bb = _choose_batch_block(B, T)
    # Query-chunk long sequences so live score VMEM is O(Tq*T), not O(T^2).
    q_chunk = 256 if (T > 512 and T % 256 == 0) else None
    # TODO(synk): for extremely long T also tile the key axis (online softmax),
    # fuse all layers into one pallas_call with a stacked-weight layer axis, and
    # optionally store inter-layer activations in bf16 to halve HBM traffic.
    kernel = make_fft_block_kernel(Bb, T, D, d_inner, n_head, d_k, d_v, K1, P1,
                                   q_chunk=q_chunk)

    param_list = [p["wqkv"], p["bqkv"], p["wo"], p["bo"], p["ln1_g"], p["ln1_b"],
                  p["w1"], p["b1"], p["w2"], p["b2"], p["ln2_g"], p["ln2_b"]]

    in_specs = [
        pl.BlockSpec((Bb, T, D), lambda b: (b, 0, 0)),
        pl.BlockSpec((Bb, 1, T), lambda b: (b, 0, 0)),
        pl.BlockSpec((Bb, T, 1), lambda b: (b, 0, 0)),
    ]
    pmode = _weight_pipeline_mode()
    for w in param_list:
        idx = lambda b, _n=w.ndim: (0,) * _n
        if pmode is not None:       # single-buffer the grid-invariant weights
            in_specs.append(pl.BlockSpec(w.shape, idx, pipeline_mode=pmode))
        else:
            in_specs.append(pl.BlockSpec(w.shape, idx))
    out_specs = pl.BlockSpec((Bb, T, D), lambda b: (b, 0, 0))

    # NOTE(v7x): the "parallel" batch-block axis is sharded across both
    # TensorCores; an even number of grid steps keeps them balanced.
    return pl.pallas_call(
        kernel,
        out_shape=jax.ShapeDtypeStruct((B, T, D), jnp.float32),
        grid_spec=pltpu.PrefetchScalarGridSpec(
            num_scalar_prefetch=0,
            grid=(B // Bb,),
            in_specs=in_specs,
            out_specs=out_specs,
        ),
        compiler_params=pltpu.CompilerParams(
            dimension_semantics=("parallel",),
            vmem_limit_bytes=_vmem_limit_bytes(),
        ),
        input_output_aliases={0: 0},   # enc updated in place across layers
    )(x, attn_bias, non_pad, *param_list)


# ----------------------------------------------------------------------------
# Encoder forward (mirrors Encoder.forward) and parameter init
# ----------------------------------------------------------------------------
def encoder_forward(src_seq, src_pos, params, cfg):
    """Mirrors Encoder.forward: returns (enc_output, non_pad_mask)."""
    pad = cfg["PAD"]
    H = cfg["encoder_head"]
    D = cfg["encoder_dim"]
    d_k = D // H
    d_v = D // H
    K1, _ = cfg["fft_conv1d_kernel"]
    P1, _ = cfg["fft_conv1d_padding"]

    # TODO(synk): embedding gather + mask construction are data-dependent
    # gathers / tiny elementwise ops; kept as plain-JAX glue rather than Pallas.
    word_emb = params["src_word_emb"][src_seq]          # (B, T, D)
    pos_emb = params["position_enc"][src_pos]           # (B, T, D)
    enc = (word_emb + pos_emb).astype(jnp.float32)

    key_is_pad = (src_seq == pad)
    non_pad = (~key_is_pad).astype(jnp.float32)[..., None]                 # (B, T, 1)
    attn_bias = jnp.where(key_is_pad, jnp.float32(-1e30),
                          jnp.float32(0.0))[:, None, :]                    # (B, 1, T)

    for lp in params["layers"]:
        enc = fft_block(enc, attn_bias, non_pad, lp,
                        n_head=H, d_k=d_k, d_v=d_v, K1=K1, P1=P1)
    return enc, non_pad


def init_params(key, cfg):
    D = cfg["encoder_dim"]
    V = cfg["vocab_size"]
    n_position = cfg["max_seq_len"] + 1
    d_inner = cfg["encoder_conv1d_filter_size"]
    H = cfg["encoder_head"]
    d_k = D // H
    d_v = D // H
    K1, K2 = cfg["fft_conv1d_kernel"]
    assert K2 == 1
    scale = 1.0 / math.sqrt(d_k)

    def nrm(k, shape, s=0.05):
        return (s * jax.random.normal(k, shape)).astype(jnp.float32)

    bf16 = jnp.bfloat16
    keys = jax.random.split(key, 2 + cfg["encoder_n_layer"])
    word = nrm(keys[0], (V, D)).at[cfg["PAD"]].set(0.0)      # padding_idx row = 0
    posi = nrm(keys[1], (n_position, D)).at[cfg["PAD"]].set(0.0)

    layers = []
    for li in range(cfg["encoder_n_layer"]):
        ks = jax.random.split(keys[2 + li], 10)
        # Per-head QKV Linears packed head-major into one (D, 3D) weight; the
        # softmax 1/sqrt(d_k) scale is folded into the Q weight & bias.
        wq = jnp.transpose(nrm(ks[0], (H, D, d_k)), (1, 0, 2)).reshape(D, D) * scale
        wk = jnp.transpose(nrm(ks[2], (H, D, d_k)), (1, 0, 2)).reshape(D, D)
        wv = jnp.transpose(nrm(ks[4], (H, D, d_v)), (1, 0, 2)).reshape(D, D)
        bq = nrm(ks[1], (H, d_k)).reshape(1, D) * scale
        bk = nrm(ks[3], (H, d_k)).reshape(1, D)
        bv = nrm(ks[5], (H, d_v)).reshape(1, D)
        lp = dict(
            wqkv=jnp.concatenate([wq, wk, wv], axis=1).astype(bf16),     # (D, 3D)
            bqkv=jnp.concatenate([bq, bk, bv], axis=1),                  # (1, 3D)
            # output projection: torch per-head (H, d_v, D) flattened head-major
            wo=nrm(ks[6], (H, d_v, D)).reshape(H * d_v, D).astype(bf16),
            bo=jnp.zeros((1, D), jnp.float32),
            ln1_g=jnp.ones((1, D), jnp.float32), ln1_b=jnp.zeros((1, D), jnp.float32),
            # Conv1d(D, d_inner, K1) kept tap-major (K1, D, d_inner) for the
            # K1 shifted-matmul formulation (torch weight[o, i, k] -> w1[k, i, o]).
            w1=nrm(ks[7], (K1, D, d_inner)).astype(bf16),
            b1=nrm(ks[8], (1, d_inner)),
            # Conv1d(d_inner, D, 1) -> plain matmul weight (C_in, C_out)
            w2=nrm(ks[9], (d_inner, D)).astype(bf16),
            b2=jnp.zeros((1, D), jnp.float32),
            ln2_g=jnp.ones((1, D), jnp.float32), ln2_b=jnp.zeros((1, D), jnp.float32),
        )
        layers.append(lp)
    return dict(src_word_emb=word, position_enc=posi, layers=layers)


# ----------------------------------------------------------------------------
# demo / smoke test
# ----------------------------------------------------------------------------
if __name__ == "__main__":
    cfg = dict(
        max_seq_len=16,
        vocab_size=20,
        encoder_dim=32,
        encoder_n_layer=2,
        encoder_head=2,
        encoder_conv1d_filter_size=64,
        PAD=0,
        dropout=0.1,                 # identity at inference
        fft_conv1d_kernel=(9, 1),
        fft_conv1d_padding=(4, 0),
    )
    key = jax.random.PRNGKey(0)
    pkey, dkey = jax.random.split(key)
    params = init_params(pkey, cfg)

    B, T = 2, 8
    tokens = jax.random.randint(dkey, (B, T), 1, cfg["vocab_size"])
    lengths = jnp.array([T, 5])                     # second sequence has trailing PADs
    pos_ids = jnp.arange(1, T + 1)[None, :]         # 1-indexed positions
    valid = pos_ids <= lengths[:, None]
    src_seq = jnp.where(valid, tokens, cfg["PAD"]).astype(jnp.int32)
    src_pos = jnp.where(valid, pos_ids, cfg["PAD"]).astype(jnp.int32)

    _weight_pipeline_mode()        # probe weight single-buffering outside jit

    run = jax.jit(lambda s, p, prm: encoder_forward(s, p, prm, cfg))
    enc_out, non_pad = run(src_seq, src_pos, params)
    jax.block_until_ready(enc_out)

    assert enc_out.shape == (B, T, cfg["encoder_dim"])
    assert non_pad.shape == (B, T, 1)
    assert bool(jnp.all(jnp.isfinite(enc_out)))
    print("KERNEL_OK")
</pallas_src>

<mosaic_0001>
module attributes {stable_mosaic.version = 11 : i64} {
  func.func @kernel(%arg0: i32, %arg1: memref<2x8x32xf32, #tpu.memory_space<vmem>>, %arg2: memref<2x1x8xf32, #tpu.memory_space<vmem>>, %arg3: memref<2x8x1xf32, #tpu.memory_space<vmem>>, %arg4: memref<32x96xbf16, #tpu.memory_space<vmem>>, %arg5: memref<1x96xf32, #tpu.memory_space<vmem>>, %arg6: memref<32x32xbf16, #tpu.memory_space<vmem>>, %arg7: memref<1x32xf32, #tpu.memory_space<vmem>>, %arg8: memref<1x32xf32, #tpu.memory_space<vmem>>, %arg9: memref<1x32xf32, #tpu.memory_space<vmem>>, %arg10: memref<9x32x64xbf16, #tpu.memory_space<vmem>>, %arg11: memref<1x64xf32, #tpu.memory_space<vmem>>, %arg12: memref<64x32xbf16, #tpu.memory_space<vmem>>, %arg13: memref<1x32xf32, #tpu.memory_space<vmem>>, %arg14: memref<1x32xf32, #tpu.memory_space<vmem>>, %arg15: memref<1x32xf32, #tpu.memory_space<vmem>>, %arg16: memref<2x8x32xf32, #tpu.memory_space<vmem>>) attributes {dimension_semantics = [#tpu.dimension_semantics<parallel>], iteration_bounds = array<i64: 1>, scalar_prefetch = 0 : i64, scratch_operands = 0 : i64, tpu.core_type = #tpu.core_type<tc>, window_params = [{transform_indices = @transform_0, window_bounds = array<i64: 2, 8, 32>}, {transform_indices = @transform_1, window_bounds = array<i64: 2, 1, 8>}, {transform_indices = @transform_2, window_bounds = array<i64: 2, 8, 1>}, {pipeline_mode = #tpu.pipeline_mode<synchronous>, transform_indices = @transform_3, window_bounds = array<i64: 32, 96>}, {pipeline_mode = #tpu.pipeline_mode<synchronous>, transform_indices = @transform_4, window_bounds = array<i64: 1, 96>}, {pipeline_mode = #tpu.pipeline_mode<synchronous>, transform_indices = @transform_5, window_bounds = array<i64: 32, 32>}, {pipeline_mode = #tpu.pipeline_mode<synchronous>, transform_indices = @transform_6, window_bounds = array<i64: 1, 32>}, {pipeline_mode = #tpu.pipeline_mode<synchronous>, transform_indices = @transform_7, window_bounds = array<i64: 1, 32>}, {pipeline_mode = #tpu.pipeline_mode<synchronous>, transform_indices = @transform_8, window_bounds = array<i64: 1, 32>}, {pipeline_mode = #tpu.pipeline_mode<synchronous>, transform_indices = @transform_9, window_bounds = array<i64: 9, 32, 64>}, {pipeline_mode = #tpu.pipeline_mode<synchronous>, transform_indices = @transform_10, window_bounds = array<i64: 1, 64>}, {pipeline_mode = #tpu.pipeline_mode<synchronous>, transform_indices = @transform_11, window_bounds = array<i64: 64, 32>}, {pipeline_mode = #tpu.pipeline_mode<synchronous>, transform_indices = @transform_12, window_bounds = array<i64: 1, 32>}, {pipeline_mode = #tpu.pipeline_mode<synchronous>, transform_indices = @transform_13, window_bounds = array<i64: 1, 32>}, {pipeline_mode = #tpu.pipeline_mode<synchronous>, transform_indices = @transform_14, window_bounds = array<i64: 1, 32>}, {transform_indices = @transform_15, window_bounds = array<i64: 2, 8, 32>}]} {
    %c0 = arith.constant 0 : index
    %c0_0 = arith.constant 0 : index
    %c0_1 = arith.constant 0 : index
    %0 = vector.load %arg1[%c0, %c0_0, %c0_1] : memref<2x8x32xf32, #tpu.memory_space<vmem>>, vector<2x8x32xf32>
    %1 = vector.shape_cast %0 : vector<2x8x32xf32> to vector<16x32xf32>
    %c0_2 = arith.constant 0 : index
    %c0_3 = arith.constant 0 : index
    %c0_4 = arith.constant 0 : index
    %2 = vector.load %arg2[%c0_2, %c0_3, %c0_4] : memref<2x1x8xf32, #tpu.memory_space<vmem>>, vector<2x1x8xf32>
    %c0_5 = arith.constant 0 : index
    %c0_6 = arith.constant 0 : index
    %c0_7 = arith.constant 0 : index
    %3 = vector.load %arg3[%c0_5, %c0_6, %c0_7] : memref<2x8x1xf32, #tpu.memory_space<vmem>>, vector<2x8x1xf32>
    %4 = vector.shape_cast %3 : vector<2x8x1xf32> to vector<16x1xf32>
    %5 = arith.truncf %1 : vector<16x32xf32> to vector<16x32xbf16>
    %c0_8 = arith.constant 0 : index
    %c0_9 = arith.constant 0 : index
    %6 = vector.load %arg4[%c0_8, %c0_9] : memref<32x96xbf16, #tpu.memory_space<vmem>>, vector<32x96xbf16>
    %cst = arith.constant dense<0.000000e+00> : vector<16x96xf32>
    %7 = tpu.matmul %5, %6, %cst {dimension_numbers = #tpu.dot_dimension_numbers<[1], [0], [0], [1], [0, 0, 1, 1], [], []>} : vector<16x32xbf16>, vector<32x96xbf16>, vector<16x96xf32> -> vector<16x96xf32>
    %c0_10 = arith.constant 0 : index
    %c0_11 = arith.constant 0 : index
    %8 = vector.load %arg5[%c0_10, %c0_11] : memref<1x96xf32, #tpu.memory_space<vmem>>, vector<1x96xf32>
    %9 = vector.broadcast %8 : vector<1x96xf32> to vector<16x96xf32>
    %10 = arith.addf %7, %9 : vector<16x96xf32>
    %11 = vector.shape_cast %10 : vector<16x96xf32> to vector<2x8x96xf32>
    %12 = vector.extract_strided_slice %11 {offsets = [0, 0, 0], sizes = [2, 8, 16], strides = [1, 1, 1]} : vector<2x8x96xf32> to vector<2x8x16xf32>
    %13 = arith.truncf %12 : vector<2x8x16xf32> to vector<2x8x16xbf16>
    %14 = vector.extract_strided_slice %11 {offsets = [0, 0, 32], sizes = [2, 8, 16], strides = [1, 1, 1]} : vector<2x8x96xf32> to vector<2x8x16xf32>
    %15 = arith.truncf %14 : vector<2x8x16xf32> to vector<2x8x16xbf16>
    %16 = vector.extract_strided_slice %11 {offsets = [0, 0, 64], sizes = [2, 8, 16], strides = [1, 1, 1]} : vector<2x8x96xf32> to vector<2x8x16xf32>
    %17 = arith.truncf %16 : vector<2x8x16xf32> to vector<2x8x16xbf16>
    "tpu.trace_start"() <{level = 10 : i32, message = "bqd,bkd->bqk"}> : () -> ()
    %cst_12 = arith.constant dense<0.000000e+00> : vector<2x8x8xf32>
    %18 = tpu.matmul %13, %15, %cst_12 {dimension_numbers = #tpu.dot_dimension_numbers<[2], [2], [1], [1], [0, 0, 0, 1, 1, 1], [0], [0]>} : vector<2x8x16xbf16>, vector<2x8x16xbf16>, vector<2x8x8xf32> -> vector<2x8x8xf32>
    "tpu.trace_stop"() : () -> ()
    %19 = vector.broadcast %2 : vector<2x1x8xf32> to vector<2x8x8xf32>
    %20 = arith.addf %18, %19 : vector<2x8x8xf32>
    %cst_13 = arith.constant dense<0xFF800000> : vector<2x8xf32>
    %21 = vector.multi_reduction <maximumf>, %20, %cst_13 [2] : vector<2x8x8xf32> to vector<2x8xf32>
    %22 = vector.shape_cast %21 : vector<2x8xf32> to vector<2x8x1xf32>
    %23 = vector.broadcast %22 : vector<2x8x1xf32> to vector<2x8x8xf32>
    %24 = arith.subf %20, %23 : vector<2x8x8xf32>
    %25 = math.exp %24 : vector<2x8x8xf32>
    %cst_14 = arith.constant dense<0.000000e+00> : vector<2x8xf32>
    %26 = vector.multi_reduction <add>, %25, %cst_14 [2] : vector<2x8x8xf32> to vector<2x8xf32>
    %27 = vector.shape_cast %26 : vector<2x8xf32> to vector<2x8x1xf32>
    %28 = tpu.reciprocal %27 {approx = true} : vector<2x8x1xf32> -> vector<2x8x1xf32>
    %29 = vector.broadcast %28 : vector<2x8x1xf32> to vector<2x8x8xf32>
    %30 = arith.mulf %25, %29 : vector<2x8x8xf32>
    %31 = arith.truncf %30 : vector<2x8x8xf32> to vector<2x8x8xbf16>
    "tpu.trace_start"() <{level = 10 : i32, message = "bqk,bkd->bqd"}> : () -> ()
    %cst_15 = arith.constant dense<0.000000e+00> : vector<2x8x16xf32>
    %32 = tpu.matmul %31, %17, %cst_15 {dimension_numbers = #tpu.dot_dimension_numbers<[2], [1], [1], [2], [0, 0, 0, 1, 1, 2], [0], [0]>} : vector<2x8x8xbf16>, vector<2x8x16xbf16>, vector<2x8x16xf32> -> vector<2x8x16xf32>
    "tpu.trace_stop"() : () -> ()
    %33 = vector.extract_strided_slice %11 {offsets = [0, 0, 16], sizes = [2, 8, 16], strides = [1, 1, 1]} : vector<2x8x96xf32> to vector<2x8x16xf32>
    %34 = arith.truncf %33 : vector<2x8x16xf32> to vector<2x8x16xbf16>
    %35 = vector.extract_strided_slice %11 {offsets = [0, 0, 48], sizes = [2, 8, 16], strides = [1, 1, 1]} : vector<2x8x96xf32> to vector<2x8x16xf32>
    %36 = arith.truncf %35 : vector<2x8x16xf32> to vector<2x8x16xbf16>
    %37 = vector.extract_strided_slice %11 {offsets = [0, 0, 80], sizes = [2, 8, 16], strides = [1, 1, 1]} : vector<2x8x96xf32> to vector<2x8x16xf32>
    %38 = arith.truncf %37 : vector<2x8x16xf32> to vector<2x8x16xbf16>
    "tpu.trace_start"() <{level = 10 : i32, message = "bqd,bkd->bqk"}> : () -> ()
    %cst_16 = arith.constant dense<0.000000e+00> : vector<2x8x8xf32>
    %39 = tpu.matmul %34, %36, %cst_16 {dimension_numbers = #tpu.dot_dimension_numbers<[2], [2], [1], [1], [0, 0, 0, 1, 1, 1], [0], [0]>} : vector<2x8x16xbf16>, vector<2x8x16xbf16>, vector<2x8x8xf32> -> vector<2x8x8xf32>
    "tpu.trace_stop"() : () -> ()
    %40 = vector.broadcast %2 : vector<2x1x8xf32> to vector<2x8x8xf32>
    %41 = arith.addf %39, %40 : vector<2x8x8xf32>
    %cst_17 = arith.constant dense<0xFF800000> : vector<2x8xf32>
    %42 = vector.multi_reduction <maximumf>, %41, %cst_17 [2] : vector<2x8x8xf32> to vector<2x8xf32>
    %43 = vector.shape_cast %42 : vector<2x8xf32> to vector<2x8x1xf32>
    %44 = vector.broadcast %43 : vector<2x8x1xf32> to vector<2x8x8xf32>
    %45 = arith.subf %41, %44 : vector<2x8x8xf32>
    %46 = math.exp %45 : vector<2x8x8xf32>
    %cst_18 = arith.constant dense<0.000000e+00> : vector<2x8xf32>
    %47 = vector.multi_reduction <add>, %46, %cst_18 [2] : vector<2x8x8xf32> to vector<2x8xf32>
    %48 = vector.shape_cast %47 : vector<2x8xf32> to vector<2x8x1xf32>
    %49 = tpu.reciprocal %48 {approx = true} : vector<2x8x1xf32> -> vector<2x8x1xf32>
    %50 = vector.broadcast %49 : vector<2x8x1xf32> to vector<2x8x8xf32>
    %51 = arith.mulf %46, %50 : vector<2x8x8xf32>
    %52 = arith.truncf %51 : vector<2x8x8xf32> to vector<2x8x8xbf16>
    "tpu.trace_start"() <{level = 10 : i32, message = "bqk,bkd->bqd"}> : () -> ()
    %cst_19 = arith.constant dense<0.000000e+00> : vector<2x8x16xf32>
    %53 = tpu.matmul %52, %38, %cst_19 {dimension_numbers = #tpu.dot_dimension_numbers<[2], [1], [1], [2], [0, 0, 0, 1, 1, 2], [0], [0]>} : vector<2x8x8xbf16>, vector<2x8x16xbf16>, vector<2x8x16xf32> -> vector<2x8x16xf32>
    "tpu.trace_stop"() : () -> ()
    %54 = tpu.concatenate %32, %53 in 2 : vector<2x8x16xf32>, vector<2x8x16xf32> -> vector<2x8x32xf32>
    %55 = vector.shape_cast %54 : vector<2x8x32xf32> to vector<16x32xf32>
    %56 = arith.truncf %55 : vector<16x32xf32> to vector<16x32xbf16>
    %c0_20 = arith.constant 0 : index
    %c0_21 = arith.constant 0 : index
    %57 = vector.load %arg6[%c0_20, %c0_21] : memref<32x32xbf16, #tpu.memory_space<vmem>>, vector<32x32xbf16>
    %cst_22 = arith.constant dense<0.000000e+00> : vector<16x32xf32>
    %58 = tpu.matmul %56, %57, %cst_22 {dimension_numbers = #tpu.dot_dimension_numbers<[1], [0], [0], [1], [0, 0, 1, 1], [], []>} : vector<16x32xbf16>, vector<32x32xbf16>, vector<16x32xf32> -> vector<16x32xf32>
    %c0_23 = arith.constant 0 : index
    %c0_24 = arith.constant 0 : index
    %59 = vector.load %arg7[%c0_23, %c0_24] : memref<1x32xf32, #tpu.memory_space<vmem>>, vector<1x32xf32>
    %60 = vector.broadcast %59 : vector<1x32xf32> to vector<16x32xf32>
    %61 = arith.addf %58, %60 : vector<16x32xf32>
    %62 = arith.addf %61, %1 : vector<16x32xf32>
    %c0_25 = arith.constant 0 : index
    %c0_26 = arith.constant 0 : index
    %63 = vector.load %arg8[%c0_25, %c0_26] : memref<1x32xf32, #tpu.memory_space<vmem>>, vector<1x32xf32>
    %c0_27 = arith.constant 0 : index
    %c0_28 = arith.constant 0 : index
    %64 = vector.load %arg9[%c0_27, %c0_28] : memref<1x32xf32, #tpu.memory_space<vmem>>, vector<1x32xf32>
    %cst_29 = arith.constant dense<0.000000e+00> : vector<16xf32>
    %65 = vector.multi_reduction <add>, %62, %cst_29 [1] : vector<16x32xf32> to vector<16xf32>
    %66 = vector.shape_cast %65 : vector<16xf32> to vector<16x1xf32>
    %cst_30 = arith.constant 3.200000e+01 : f32
    %67 = vector.broadcast %cst_30 : f32 to vector<16x1xf32>
    %68 = arith.divf %66, %67 : vector<16x1xf32>
    %69 = arith.mulf %62, %62 : vector<16x32xf32>
    %cst_31 = arith.constant dense<0.000000e+00> : vector<16xf32>
    %70 = vector.multi_reduction <add>, %69, %cst_31 [1] : vector<16x32xf32> to vector<16xf32>
    %71 = vector.shape_cast %70 : vector<16xf32> to vector<16x1xf32>
    %cst_32 = arith.constant 3.200000e+01 : f32
    %72 = vector.broadcast %cst_32 : f32 to vector<16x1xf32>
    %73 = arith.divf %71, %72 : vector<16x1xf32>
    %74 = arith.mulf %68, %68 : vector<16x1xf32>
    %75 = arith.subf %73, %74 : vector<16x1xf32>
    %76 = vector.broadcast %68 : vector<16x1xf32> to vector<16x32xf32>
    %77 = arith.subf %62, %76 : vector<16x32xf32>
    %cst_33 = arith.constant 9.99999974E-6 : f32
    %78 = vector.broadcast %cst_33 : f32 to vector<16x1xf32>
    %79 = arith.addf %75, %78 : vector<16x1xf32>
    %80 = math.rsqrt %79 : vector<16x1xf32>
    %81 = vector.broadcast %80 : vector<16x1xf32> to vector<16x32xf32>
    %82 = arith.mulf %77, %81 : vector<16x32xf32>
    %83 = vector.broadcast %63 : vector<1x32xf32> to vector<16x32xf32>
    %84 = arith.mulf %82, %83 : vector<16x32xf32>
    %85 = vector.broadcast %64 : vector<1x32xf32> to vector<16x32xf32>
    %86 = arith.addf %84, %85 : vector<16x32xf32>
    %87 = vector.broadcast %4 : vector<16x1xf32> to vector<16x32xf32>
    %88 = arith.mulf %86, %87 : vector<16x32xf32>
    %89 = tpu.iota {dimensions = array<i32: 0>} : vector<16x1xi32>
    %c8_i32 = arith.constant 8 : i32
    %c0_i32 = arith.constant 0 : i32
    %90 = arith.cmpi eq, %c8_i32, %c0_i32 : i32
    %c1_i32 = arith.constant 1 : i32
    %91 = arith.select %90, %c1_i32, %c8_i32 : i32
    %92 = vector.broadcast %91 : i32 to vector<16x1xi32>
    %93 = arith.remsi %89, %92 : vector<16x1xi32>
    %c0_i32_34 = arith.constant 0 : i32
    %94 = vector.broadcast %c0_i32_34 : i32 to vector<16x1xi32>
    %95 = arith.cmpi ne, %93, %94 : vector<16x1xi32>
    %c0_i32_35 = arith.constant 0 : i32
    %96 = vector.broadcast %c0_i32_35 : i32 to vector<16x1xi32>
    %97 = arith.cmpi slt, %93, %96 : vector<16x1xi32>
    %c0_i32_36 = arith.constant 0 : i32
    %98 = arith.cmpi slt, %91, %c0_i32_36 : i32
    %99 = vector.broadcast %98 : i1 to vector<16x1xi1>
    %100 = vector.broadcast %99 : vector<16x1xi1> to vector<16x1xi1>
    %101 = arith.xori %97, %100 : vector<16x1xi1>
    %102 = arith.andi %101, %95 : vector<16x1xi1>
    %103 = vector.broadcast %91 : i32 to vector<16x1xi32>
    %104 = arith.addi %93, %103 : vector<16x1xi32>
    %105 = arith.select %102, %104, %93 : vector<16x1xi1>, vector<16x1xi32>
    %cst_37 = arith.constant 0.000000e+00 : f32
    %106 = vector.broadcast %cst_37 : f32 to vector<16x64xf32>
    %c4_i32 = arith.constant 4 : i32
    %107 = tpu.dynamic_rotate %88 by %c4_i32 dim 0 : vector<16x32xf32>, i32 -> vector<16x32xf32>
    %c4_i32_38 = arith.constant 4 : i32
    %108 = vector.broadcast %c4_i32_38 : i32 to vector<16x1xi32>
    %109 = arith.cmpi sge, %105, %108 : vector<16x1xi32>
    %c12_i32 = arith.constant 12 : i32
    %110 = vector.broadcast %c12_i32 : i32 to vector<16x1xi32>
    %111 = arith.cmpi slt, %105, %110 : vector<16x1xi32>
    %112 = arith.andi %109, %111 : vector<16x1xi1>
    %cst_39 = arith.constant 0.000000e+00 : f32
    %113 = vector.shape_cast %112 : vector<16x1xi1> to vector<16x1xi1>
    %114 = vector.broadcast %113 : vector<16x1xi1> to vector<16x32xi1>
    %115 = vector.broadcast %cst_39 : f32 to vector<16x32xf32>
    %116 = arith.select %114, %107, %115 : vector<16x32xi1>, vector<16x32xf32>
    %117 = arith.truncf %116 : vector<16x32xf32> to vector<16x32xbf16>
    %c0_40 = arith.constant 0 : index
    %c0_41 = arith.constant 0 : index
    %c0_42 = arith.constant 0 : index
    %118 = vector.load %arg10[%c0_40, %c0_41, %c0_42] : memref<9x32x64xbf16, #tpu.memory_space<vmem>>, vector<1x32x64xbf16>
    %119 = vector.shape_cast %118 : vector<1x32x64xbf16> to vector<32x64xbf16>
    %cst_43 = arith.constant dense<0.000000e+00> : vector<16x64xf32>
    %120 = tpu.matmul %117, %119, %cst_43 {dimension_numbers = #tpu.dot_dimension_numbers<[1], [0], [0], [1], [0, 0, 1, 1], [], []>} : vector<16x32xbf16>, vector<32x64xbf16>, vector<16x64xf32> -> vector<16x64xf32>
    %121 = arith.addf %106, %120 : vector<16x64xf32>
    %c3_i32 = arith.constant 3 : i32
    %122 = tpu.dynamic_rotate %88 by %c3_i32 dim 0 : vector<16x32xf32>, i32 -> vector<16x32xf32>
    %c3_i32_44 = arith.constant 3 : i32
    %123 = vector.broadcast %c3_i32_44 : i32 to vector<16x1xi32>
    %124 = arith.cmpi sge, %105, %123 : vector<16x1xi32>
    %c11_i32 = arith.constant 11 : i32
    %125 = vector.broadcast %c11_i32 : i32 to vector<16x1xi32>
    %126 = arith.cmpi slt, %105, %125 : vector<16x1xi32>
    %127 = arith.andi %124, %126 : vector<16x1xi1>
    %cst_45 = arith.constant 0.000000e+00 : f32
    %128 = vector.shape_cast %127 : vector<16x1xi1> to vector<16x1xi1>
    %129 = vector.broadcast %128 : vector<16x1xi1> to vector<16x32xi1>
    %130 = vector.broadcast %cst_45 : f32 to vector<16x32xf32>
    %131 = arith.select %129, %122, %130 : vector<16x32xi1>, vector<16x32xf32>
    %132 = arith.truncf %131 : vector<16x32xf32> to vector<16x32xbf16>
    %c1 = arith.constant 1 : index
    %c0_46 = arith.constant 0 : index
    %c0_47 = arith.constant 0 : index
    %133 = vector.load %arg10[%c1, %c0_46, %c0_47] : memref<9x32x64xbf16, #tpu.memory_space<vmem>>, vector<1x32x64xbf16>
    %134 = vector.shape_cast %133 : vector<1x32x64xbf16> to vector<32x64xbf16>
    %cst_48 = arith.constant dense<0.000000e+00> : vector<16x64xf32>
    %135 = tpu.matmul %132, %134, %cst_48 {dimension_numbers = #tpu.dot_dimension_numbers<[1], [0], [0], [1], [0, 0, 1, 1], [], []>} : vector<16x32xbf16>, vector<32x64xbf16>, vector<16x64xf32> -> vector<16x64xf32>
    %136 = arith.addf %121, %135 : vector<16x64xf32>
    %c2_i32 = arith.constant 2 : i32
    %137 = tpu.dynamic_rotate %88 by %c2_i32 dim 0 : vector<16x32xf32>, i32 -> vector<16x32xf32>
    %c2_i32_49 = arith.constant 2 : i32
    %138 = vector.broadcast %c2_i32_49 : i32 to vector<16x1xi32>
    %139 = arith.cmpi sge, %105, %138 : vector<16x1xi32>
    %c10_i32 = arith.constant 10 : i32
    %140 = vector.broadcast %c10_i32 : i32 to vector<16x1xi32>
    %141 = arith.cmpi slt, %105, %140 : vector<16x1xi32>
    %142 = arith.andi %139, %141 : vector<16x1xi1>
    %cst_50 = arith.constant 0.000000e+00 : f32
    %143 = vector.shape_cast %142 : vector<16x1xi1> to vector<16x1xi1>
    %144 = vector.broadcast %143 : vector<16x1xi1> to vector<16x32xi1>
    %145 = vector.broadcast %cst_50 : f32 to vector<16x32xf32>
    %146 = arith.select %144, %137, %145 : vector<16x32xi1>, vector<16x32xf32>
    %147 = arith.truncf %146 : vector<16x32xf32> to vector<16x32xbf16>
    %c2 = arith.constant 2 : index
    %c0_51 = arith.constant 0 : index
    %c0_52 = arith.constant 0 : index
    %148 = vector.load %arg10[%c2, %c0_51, %c0_52] : memref<9x32x64xbf16, #tpu.memory_space<vmem>>, vector<1x32x64xbf16>
    %149 = vector.shape_cast %148 : vector<1x32x64xbf16> to vector<32x64xbf16>
    %cst_53 = arith.constant dense<0.000000e+00> : vector<16x64xf32>
    %150 = tpu.matmul %147, %149, %cst_53 {dimension_numbers = #tpu.dot_dimension_numbers<[1], [0], [0], [1], [0, 0, 1, 1], [], []>} : vector<16x32xbf16>, vector<32x64xbf16>, vector<16x64xf32> -> vector<16x64xf32>
    %151 = arith.addf %136, %150 : vector<16x64xf32>
    %c1_i32_54 = arith.constant 1 : i32
    %152 = tpu.dynamic_rotate %88 by %c1_i32_54 dim 0 : vector<16x32xf32>, i32 -> vector<16x32xf32>
    %c1_i32_55 = arith.constant 1 : i32
    %153 = vector.broadcast %c1_i32_55 : i32 to vector<16x1xi32>
    %154 = arith.cmpi sge, %105, %153 : vector<16x1xi32>
    %c9_i32 = arith.constant 9 : i32
    %155 = vector.broadcast %c9_i32 : i32 to vector<16x1xi32>
    %156 = arith.cmpi slt, %105, %155 : vector<16x1xi32>
    %157 = arith.andi %154, %156 : vector<16x1xi1>
    %cst_56 = arith.constant 0.000000e+00 : f32
    %158 = vector.shape_cast %157 : vector<16x1xi1> to vector<16x1xi1>
    %159 = vector.broadcast %158 : vector<16x1xi1> to vector<16x32xi1>
    %160 = vector.broadcast %cst_56 : f32 to vector<16x32xf32>
    %161 = arith.select %159, %152, %160 : vector<16x32xi1>, vector<16x32xf32>
    %162 = arith.truncf %161 : vector<16x32xf32> to vector<16x32xbf16>
    %c3 = arith.constant 3 : index
    %c0_57 = arith.constant 0 : index
    %c0_58 = arith.constant 0 : index
    %163 = vector.load %arg10[%c3, %c0_57, %c0_58] : memref<9x32x64xbf16, #tpu.memory_space<vmem>>, vector<1x32x64xbf16>
    %164 = vector.shape_cast %163 : vector<1x32x64xbf16> to vector<32x64xbf16>
    %cst_59 = arith.constant dense<0.000000e+00> : vector<16x64xf32>
    %165 = tpu.matmul %162, %164, %cst_59 {dimension_numbers = #tpu.dot_dimension_numbers<[1], [0], [0], [1], [0, 0, 1, 1], [], []>} : vector<16x32xbf16>, vector<32x64xbf16>, vector<16x64xf32> -> vector<16x64xf32>
    %166 = arith.addf %151, %165 : vector<16x64xf32>
    %167 = arith.truncf %88 : vector<16x32xf32> to vector<16x32xbf16>
    %c4 = arith.constant 4 : index
    %c0_60 = arith.constant 0 : index
    %c0_61 = arith.constant 0 : index
    %168 = vector.load %arg10[%c4, %c0_60, %c0_61] : memref<9x32x64xbf16, #tpu.memory_space<vmem>>, vector<1x32x64xbf16>
    %169 = vector.shape_cast %168 : vector<1x32x64xbf16> to vector<32x64xbf16>
    %cst_62 = arith.constant dense<0.000000e+00> : vector<16x64xf32>
    %170 = tpu.matmul %167, %169, %cst_62 {dimension_numbers = #tpu.dot_dimension_numbers<[1], [0], [0], [1], [0, 0, 1, 1], [], []>} : vector<16x32xbf16>, vector<32x64xbf16>, vector<16x64xf32> -> vector<16x64xf32>
    %171 = arith.addf %166, %170 : vector<16x64xf32>
    %c15_i32 = arith.constant 15 : i32
    %172 = tpu.dynamic_rotate %88 by %c15_i32 dim 0 : vector<16x32xf32>, i32 -> vector<16x32xf32>
    %c-1_i32 = arith.constant -1 : i32
    %173 = vector.broadcast %c-1_i32 : i32 to vector<16x1xi32>
    %174 = arith.cmpi sge, %105, %173 : vector<16x1xi32>
    %c7_i32 = arith.constant 7 : i32
    %175 = vector.broadcast %c7_i32 : i32 to vector<16x1xi32>
    %176 = arith.cmpi slt, %105, %175 : vector<16x1xi32>
    %177 = arith.andi %174, %176 : vector<16x1xi1>
    %cst_63 = arith.constant 0.000000e+00 : f32
    %178 = vector.shape_cast %177 : vector<16x1xi1> to vector<16x1xi1>
    %179 = vector.broadcast %178 : vector<16x1xi1> to vector<16x32xi1>
    %180 = vector.broadcast %cst_63 : f32 to vector<16x32xf32>
    %181 = arith.select %179, %172, %180 : vector<16x32xi1>, vector<16x32xf32>
    %182 = arith.truncf %181 : vector<16x32xf32> to vector<16x32xbf16>
    %c5 = arith.constant 5 : index
    %c0_64 = arith.constant 0 : index
    %c0_65 = arith.constant 0 : index
    %183 = vector.load %arg10[%c5, %c0_64, %c0_65] : memref<9x32x64xbf16, #tpu.memory_space<vmem>>, vector<1x32x64xbf16>
    %184 = vector.shape_cast %183 : vector<1x32x64xbf16> to vector<32x64xbf16>
    %cst_66 = arith.constant dense<0.000000e+00> : vector<16x64xf32>
    %185 = tpu.matmul %182, %184, %cst_66 {dimension_numbers = #tpu.dot_dimension_numbers<[1], [0], [0], [1], [0, 0, 1, 1], [], []>} : vector<16x32xbf16>, vector<32x64xbf16>, vector<16x64xf32> -> vector<16x64xf32>
    %186 = arith.addf %171, %185 : vector<16x64xf32>
    %c14_i32 = arith.constant 14 : i32
    %187 = tpu.dynamic_rotate %88 by %c14_i32 dim 0 : vector<16x32xf32>, i32 -> vector<16x32xf32>
    %c-2_i32 = arith.constant -2 : i32
    %188 = vector.broadcast %c-2_i32 : i32 to vector<16x1xi32>
    %189 = arith.cmpi sge, %105, %188 : vector<16x1xi32>
    %c6_i32 = arith.constant 6 : i32
    %190 = vector.broadcast %c6_i32 : i32 to vector<16x1xi32>
    %191 = arith.cmpi slt, %105, %190 : vector<16x1xi32>
    %192 = arith.andi %189, %191 : vector<16x1xi1>
    %cst_67 = arith.constant 0.000000e+00 : f32
    %193 = vector.shape_cast %192 : vector<16x1xi1> to vector<16x1xi1>
    %194 = vector.broadcast %193 : vector<16x1xi1> to vector<16x32xi1>
    %195 = vector.broadcast %cst_67 : f32 to vector<16x32xf32>
    %196 = arith.select %194, %187, %195 : vector<16x32xi1>, vector<16x32xf32>
    %197 = arith.truncf %196 : vector<16x32xf32> to vector<16x32xbf16>
    %c6 = arith.constant 6 : index
    %c0_68 = arith.constant 0 : index
    %c0_69 = arith.constant 0 : index
    %198 = vector.load %arg10[%c6, %c0_68, %c0_69] : memref<9x32x64xbf16, #tpu.memory_space<vmem>>, vector<1x32x64xbf16>
    %199 = vector.shape_cast %198 : vector<1x32x64xbf16> to vector<32x64xbf16>
    %cst_70 = arith.constant dense<0.000000e+00> : vector<16x64xf32>
    %200 = tpu.matmul %197, %199, %cst_70 {dimension_numbers = #tpu.dot_dimension_numbers<[1], [0], [0], [1], [0, 0, 1, 1], [], []>} : vector<16x32xbf16>, vector<32x64xbf16>, vector<16x64xf32> -> vector<16x64xf32>
    %201 = arith.addf %186, %200 : vector<16x64xf32>
    %c13_i32 = arith.constant 13 : i32
    %202 = tpu.dynamic_rotate %88 by %c13_i32 dim 0 : vector<16x32xf32>, i32 -> vector<16x32xf32>
    %c-3_i32 = arith.constant -3 : i32
    %203 = vector.broadcast %c-3_i32 : i32 to vector<16x1xi32>
    %204 = arith.cmpi sge, %105, %203 : vector<16x1xi32>
    %c5_i32 = arith.constant 5 : i32
    %205 = vector.broadcast %c5_i32 : i32 to vector<16x1xi32>
    %206 = arith.cmpi slt, %105, %205 : vector<16x1xi32>
    %207 = arith.andi %204, %206 : vector<16x1xi1>
    %cst_71 = arith.constant 0.000000e+00 : f32
    %208 = vector.shape_cast %207 : vector<16x1xi1> to vector<16x1xi1>
    %209 = vector.broadcast %208 : vector<16x1xi1> to vector<16x32xi1>
    %210 = vector.broadcast %cst_71 : f32 to vector<16x32xf32>
    %211 = arith.select %209, %202, %210 : vector<16x32xi1>, vector<16x32xf32>
    %212 = arith.truncf %211 : vector<16x32xf32> to vector<16x32xbf16>
    %c7 = arith.constant 7 : index
    %c0_72 = arith.constant 0 : index
    %c0_73 = arith.constant 0 : index
    %213 = vector.load %arg10[%c7, %c0_72, %c0_73] : memref<9x32x64xbf16, #tpu.memory_space<vmem>>, vector<1x32x64xbf16>
    %214 = vector.shape_cast %213 : vector<1x32x64xbf16> to vector<32x64xbf16>
    %cst_74 = arith.constant dense<0.000000e+00> : vector<16x64xf32>
    %215 = tpu.matmul %212, %214, %cst_74 {dimension_numbers = #tpu.dot_dimension_numbers<[1], [0], [0], [1], [0, 0, 1, 1], [], []>} : vector<16x32xbf16>, vector<32x64xbf16>, vector<16x64xf32> -> vector<16x64xf32>
    %216 = arith.addf %201, %215 : vector<16x64xf32>
    %c12_i32_75 = arith.constant 12 : i32
    %217 = tpu.dynamic_rotate %88 by %c12_i32_75 dim 0 : vector<16x32xf32>, i32 -> vector<16x32xf32>
    %c-4_i32 = arith.constant -4 : i32
    %218 = vector.broadcast %c-4_i32 : i32 to vector<16x1xi32>
    %219 = arith.cmpi sge, %105, %218 : vector<16x1xi32>
    %c4_i32_76 = arith.constant 4 : i32
    %220 = vector.broadcast %c4_i32_76 : i32 to vector<16x1xi32>
    %221 = arith.cmpi slt, %105, %220 : vector<16x1xi32>
    %222 = arith.andi %219, %221 : vector<16x1xi1>
    %cst_77 = arith.constant 0.000000e+00 : f32
    %223 = vector.shape_cast %222 : vector<16x1xi1> to vector<16x1xi1>
    %224 = vector.broadcast %223 : vector<16x1xi1> to vector<16x32xi1>
    %225 = vector.broadcast %cst_77 : f32 to vector<16x32xf32>
    %226 = arith.select %224, %217, %225 : vector<16x32xi1>, vector<16x32xf32>
    %227 = arith.truncf %226 : vector<16x32xf32> to vector<16x32xbf16>
    %c8 = arith.constant 8 : index
    %c0_78 = arith.constant 0 : index
    %c0_79 = arith.constant 0 : index
    %228 = vector.load %arg10[%c8, %c0_78, %c0_79] : memref<9x32x64xbf16, #tpu.memory_space<vmem>>, vector<1x32x64xbf16>
    %229 = vector.shape_cast %228 : vector<1x32x64xbf16> to vector<32x64xbf16>
    %cst_80 = arith.constant dense<0.000000e+00> : vector<16x64xf32>
    %230 = tpu.matmul %227, %229, %cst_80 {dimension_numbers = #tpu.dot_dimension_numbers<[1], [0], [0], [1], [0, 0, 1, 1], [], []>} : vector<16x32xbf16>, vector<32x64xbf16>, vector<16x64xf32> -> vector<16x64xf32>
    %231 = arith.addf %216, %230 : vector<16x64xf32>
    %c0_81 = arith.constant 0 : index
    %c0_82 = arith.constant 0 : index
    %232 = vector.load %arg11[%c0_81, %c0_82] : memref<1x64xf32, #tpu.memory_space<vmem>>, vector<1x64xf32>
    %233 = vector.broadcast %232 : vector<1x64xf32> to vector<16x64xf32>
    %234 = arith.addf %231, %233 : vector<16x64xf32>
    %cst_83 = arith.constant 0.000000e+00 : f32
    %235 = vector.broadcast %cst_83 : f32 to vector<16x64xf32>
    %236 = arith.maximumf %234, %235 : vector<16x64xf32>
    %237 = arith.truncf %236 : vector<16x64xf32> to vector<16x64xbf16>
    %c0_84 = arith.constant 0 : index
    %c0_85 = arith.constant 0 : index
    %238 = vector.load %arg12[%c0_84, %c0_85] : memref<64x32xbf16, #tpu.memory_space<vmem>>, vector<64x32xbf16>
    %cst_86 = arith.constant dense<0.000000e+00> : vector<16x32xf32>
    %239 = tpu.matmul %237, %238, %cst_86 {dimension_numbers = #tpu.dot_dimension_numbers<[1], [0], [0], [1], [0, 0, 1, 1], [], []>} : vector<16x64xbf16>, vector<64x32xbf16>, vector<16x32xf32> -> vector<16x32xf32>
    %c0_87 = arith.constant 0 : index
    %c0_88 = arith.constant 0 : index
    %240 = vector.load %arg13[%c0_87, %c0_88] : memref<1x32xf32, #tpu.memory_space<vmem>>, vector<1x32xf32>
    %241 = vector.broadcast %240 : vector<1x32xf32> to vector<16x32xf32>
    %242 = arith.addf %239, %241 : vector<16x32xf32>
    %243 = arith.addf %242, %88 : vector<16x32xf32>
    %c0_89 = arith.constant 0 : index
    %c0_90 = arith.constant 0 : index
    %244 = vector.load %arg14[%c0_89, %c0_90] : memref<1x32xf32, #tpu.memory_space<vmem>>, vector<1x32xf32>
    %c0_91 = arith.constant 0 : index
    %c0_92 = arith.constant 0 : index
    %245 = vector.load %arg15[%c0_91, %c0_92] : memref<1x32xf32, #tpu.memory_space<vmem>>, vector<1x32xf32>
    %cst_93 = arith.constant dense<0.000000e+00> : vector<16xf32>
    %246 = vector.multi_reduction <add>, %243, %cst_93 [1] : vector<16x32xf32> to vector<16xf32>
    %247 = vector.shape_cast %246 : vector<16xf32> to vector<16x1xf32>
    %cst_94 = arith.constant 3.200000e+01 : f32
    %248 = vector.broadcast %cst_94 : f32 to vector<16x1xf32>
    %249 = arith.divf %247, %248 : vector<16x1xf32>
    %250 = arith.mulf %243, %243 : vector<16x32xf32>
    %cst_95 = arith.constant dense<0.000000e+00> : vector<16xf32>
    %251 = vector.multi_reduction <add>, %250, %cst_95 [1] : vector<16x32xf32> to vector<16xf32>
    %252 = vector.shape_cast %251 : vector<16xf32> to vector<16x1xf32>
    %cst_96 = arith.constant 3.200000e+01 : f32
    %253 = vector.broadcast %cst_96 : f32 to vector<16x1xf32>
    %254 = arith.divf %252, %253 : vector<16x1xf32>
    %255 = arith.mulf %249, %249 : vector<16x1xf32>
    %256 = arith.subf %254, %255 : vector<16x1xf32>
    %257 = vector.broadcast %249 : vector<16x1xf32> to vector<16x32xf32>
    %258 = arith.subf %243, %257 : vector<16x32xf32>
    %cst_97 = arith.constant 9.99999974E-6 : f32
    %259 = vector.broadcast %cst_97 : f32 to vector<16x1xf32>
    %260 = arith.addf %256, %259 : vector<16x1xf32>
    %261 = math.rsqrt %260 : vector<16x1xf32>
    %262 = vector.broadcast %261 : vector<16x1xf32> to vector<16x32xf32>
    %263 = arith.mulf %258, %262 : vector<16x32xf32>
    %264 = vector.broadcast %244 : vector<1x32xf32> to vector<16x32xf32>
    %265 = arith.mulf %263, %264 : vector<16x32xf32>
    %266 = vector.broadcast %245 : vector<1x32xf32> to vector<16x32xf32>
    %267 = arith.addf %265, %266 : vector<16x32xf32>
    %268 = vector.broadcast %4 : vector<16x1xf32> to vector<16x32xf32>
    %269 = arith.mulf %267, %268 : vector<16x32xf32>
    %270 = vector.shape_cast %269 : vector<16x32xf32> to vector<2x8x32xf32>
    %c0_98 = arith.constant 0 : index
    %c0_99 = arith.constant 0 : index
    %c0_100 = arith.constant 0 : index
    %271 = vector.load %arg16[%c0_98, %c0_99, %c0_100] : memref<2x8x32xf32, #tpu.memory_space<vmem>>, vector<2x8x32xf32>
    tpu.vector_store %arg16[%c0_98, %c0_99, %c0_100], %270 {strides = array<i32>} : memref<2x8x32xf32, #tpu.memory_space<vmem>>, vector<2x8x32xf32>,
    return
  }
  func.func @transform_0(%arg0: i32) -> (i32, i32, i32) {
    %c0_i32 = arith.constant 0 : i32
    %c0_i32_0 = arith.constant 0 : i32
    %c0_i32_1 = arith.constant 0 : i32
    return %arg0, %c0_i32, %c0_i32_0 : i32, i32, i32
  }
  func.func @transform_1(%arg0: i32) -> (i32, i32, i32) {
    %c0_i32 = arith.constant 0 : i32
    %c0_i32_0 = arith.constant 0 : i32
    %c0_i32_1 = arith.constant 0 : i32
    return %arg0, %c0_i32, %c0_i32_0 : i32, i32, i32
  }
  func.func @transform_2(%arg0: i32) -> (i32, i32, i32) {
    %c0_i32 = arith.constant 0 : i32
    %c0_i32_0 = arith.constant 0 : i32
    %c0_i32_1 = arith.constant 0 : i32
    return %arg0, %c0_i32, %c0_i32_0 : i32, i32, i32
  }
  func.func @transform_3(%arg0: i32) -> (i32, i32) {
    %c0_i32 = arith.constant 0 : i32
    %c0_i32_0 = arith.constant 0 : i32
    %c0_i32_1 = arith.constant 0 : i32
    return %c0_i32, %c0_i32_0 : i32, i32
  }
  func.func @transform_4(%arg0: i32) -> (i32, i32) {
    %c0_i32 = arith.constant 0 : i32
    %c0_i32_0 = arith.constant 0 : i32
    %c0_i32_1 = arith.constant 0 : i32
    return %c0_i32, %c0_i32_0 : i32, i32
  }
  func.func @transform_5(%arg0: i32) -> (i32, i32) {
    %c0_i32 = arith.constant 0 : i32
    %c0_i32_0 = arith.constant 0 : i32
    %c0_i32_1 = arith.constant 0 : i32
    return %c0_i32, %c0_i32_0 : i32, i32
  }
  func.func @transform_6(%arg0: i32) -> (i32, i32) {
    %c0_i32 = arith.constant 0 : i32
    %c0_i32_0 = arith.constant 0 : i32
    %c0_i32_1 = arith.constant 0 : i32
    return %c0_i32, %c0_i32_0 : i32, i32
  }
  func.func @transform_7(%arg0: i32) -> (i32, i32) {
    %c0_i32 = arith.constant 0 : i32
    %c0_i32_0 = arith.constant 0 : i32
    %c0_i32_1 = arith.constant 0 : i32
    return %c0_i32, %c0_i32_0 : i32, i32
  }
  func.func @transform_8(%arg0: i32) -> (i32, i32) {
    %c0_i32 = arith.constant 0 : i32
    %c0_i32_0 = arith.constant 0 : i32
    %c0_i32_1 = arith.constant 0 : i32
    return %c0_i32, %c0_i32_0 : i32, i32
  }
  func.func @transform_9(%arg0: i32) -> (i32, i32, i32) {
    %c0_i32 = arith.constant 0 : i32
    %c0_i32_0 = arith.constant 0 : i32
    %c0_i32_1 = arith.constant 0 : i32
    %c0_i32_2 = arith.constant 0 : i32
    return %c0_i32, %c0_i32_0, %c0_i32_1 : i32, i32, i32
  }
  func.func @transform_10(%arg0: i32) -> (i32, i32) {
    %c0_i32 = arith.constant 0 : i32
    %c0_i32_0 = arith.constant 0 : i32
    %c0_i32_1 = arith.constant 0 : i32
    return %c0_i32, %c0_i32_0 : i32, i32
  }
  func.func @transform_11(%arg0: i32) -> (i32, i32) {
    %c0_i32 = arith.constant 0 : i32
    %c0_i32_0 = arith.constant 0 : i32
    %c0_i32_1 = arith.constant 0 : i32
    return %c0_i32, %c0_i32_0 : i32, i32
  }
  func.func @transform_12(%arg0: i32) -> (i32, i32) {
    %c0_i32 = arith.constant 0 : i32
    %c0_i32_0 = arith.constant 0 : i32
    %c0_i32_1 = arith.constant 0 : i32
    return %c0_i32, %c0_i32_0 : i32, i32
  }
  func.func @transform_13(%arg0: i32) -> (i32, i32) {
    %c0_i32 = arith.constant 0 : i32
    %c0_i32_0 = arith.constant 0 : i32
    %c0_i32_1 = arith.constant 0 : i32
    return %c0_i32, %c0_i32_0 : i32, i32
  }
  func.func @transform_14(%arg0: i32) -> (i32, i32) {
    %c0_i32 = arith.constant 0 : i32
    %c0_i32_0 = arith.constant 0 : i32
    %c0_i32_1 = arith.constant 0 : i32
    return %c0_i32, %c0_i32_0 : i32, i32
  }
  func.func @transform_15(%arg0: i32) -> (i32, i32, i32) {
    %c0_i32 = arith.constant 0 : i32
    %c0_i32_0 = arith.constant 0 : i32
    %c0_i32_1 = arith.constant 0 : i32
    return %arg0, %c0_i32, %c0_i32_0 : i32, i32, i32
  }
}

</mosaic_0001>

<bundles_post_ra>
// kernel: _lambda_.2
= control target key start
LH: loop header
LB: loop body
LE: loop exit
PB: predicated region body
PF: predicated region fallthrough
CT: control target
= control target key end

     0   :  { %20 = vsyncpa [#allocation3], 0  ;;  %s3136_s0 = inlined_call_operand.hbm [shape: f32[2,8,32], index: 0, kind: input, shape index: {}, may-alias: {0,15}]   ;;  %s3137_s1 = inlined_call_operand.hbm [shape: f32[2,1,8], index: 1, kind: input, shape index: {}]   ;;  %s3138_s2 = inlined_call_operand.hbm [shape: f32[2,8,1], index: 2, kind: input, shape index: {}]   ;;  %s3139_s3 = inlined_call_operand.hbm [shape: bf16[32,96], index: 3, kind: input, shape index: {}]   ;;  %s3140_s4 = inlined_call_operand.hbm [shape: f32[1,96], index: 4, kind: input, shape index: {}]   ;;  %s3141_s5 = inlined_call_operand.hbm [shape: bf16[32,32], index: 5, kind: input, shape index: {}]   ;;  %s3142_s6 = inlined_call_operand.hbm [shape: f32[1,32], index: 6, kind: input, shape index: {}]   ;;  %s3143_s7 = inlined_call_operand.hbm [shape: f32[1,32], index: 7, kind: input, shape index: {}]   ;;  %s3144_s8 = inlined_call_operand.hbm [shape: f32[1,32], index: 8, kind: input, shape index: {}]   ;;  %s3145_s9 = inlined_call_operand.hbm [shape: bf16[9,32,64], index: 9, kind: input, shape index: {}]   ;;  %s3146_s10 = inlined_call_operand.hbm [shape: f32[1,64], index: 10, kind: input, shape index: {}]   ;;  %s3147_s11 = inlined_call_operand.hbm [shape: bf16[64,32], index: 11, kind: input, shape index: {}]   ;;  %s3148_s12 = inlined_call_operand.hbm [shape: f32[1,32], index: 12, kind: input, shape index: {}]   ;;  %s3149_s13 = inlined_call_operand.hbm [shape: f32[1,32], index: 13, kind: input, shape index: {}]   ;;  %s3150_s14 = inlined_call_operand.hbm [shape: f32[1,32], index: 14, kind: input, shape index: {}]   ;;  %s3151_s15 = inlined_call_operand.hbm [shape: f32[2,8,32], index: 15, kind: output, shape index: {}, may-alias: {0,15}]  }
   0x1   :  { %21 = vsyncpa [#allocation6], 0 }
   0x2   :  { %22 = vsyncpa [#allocation9], 0 }
   0x3   :  { %23 = vsyncpa [#allocation12], 0 }
   0x4   :  { %24 = vsyncpa [#allocation15], 0 }
   0x5   :  { %25 = vsyncpa [#allocation18], 0 }
   0x6   :  { %26 = vsyncpa [#allocation21], 0 }
   0x7   :  { %27 = vsyncpa [#allocation24], 0 }
   0x8   :  { %28 = vsyncpa [#allocation4], 0  ;;  %s2527_s18 = smov [#allocation5]   ;;  %s2157_s22 = scalar_lea.hbm %s3137_s1, 32 }
   0x9   :  { %s46_s19 = sshll.u32 %s2527_s18, 4  ;;  %p2158_p0 = scmp.ne.s32.totalorder %s3137_s1, %s2157_s22  ;;  %s47_s19 = int_to_ptr.vmem [resolvable:$true] %s46_s19 }
   0xa   :  { %p2161_p1 = scmp.lt.u32.totalorder %s2157_s22, %s3137_s1 }
   0xc   :  { %p2163_p2 = pnand %p2161_p1, %p2158_p0 }
   0xe   :  { %2166 = shalt.err (!%p2163_p2)
}
   0xf   :  { %s2167_s27 = scalar_lea.vmem %s47_s19, 32  ;;  %p2172_p4 = scmp.lt.s32.totalorder %s47_s19, %s47_s19 }
  0x10   :  { %p2168_p3 = scmp.ne.s32.totalorder %s47_s19, %s2167_s27  ;;  %p2173_p5 = scmp.lt.s32.totalorder %s2167_s27, %s2167_s27 }
  0x12   :  { %p2174_p6 = por %p2173_p5, %p2172_p4 }
  0x14   :  { %p2175_p7 = pnand %p2174_p6, %p2168_p3 }
  0x16   :  { %2178 = shalt.err (!%p2175_p7)
}
  0x17   :  { %s3152_s28 = smov 16   ;;  %s2529_s29 = smov 1  }
  0x18   :  { %52 = dma.hbm_to_vmem [thread:$0]  %s3137_s1, 32, %s47_s19, [#allocation6], %s3152_s28, %s3152_s28, %s2529_s29  }
  0x19   :  { %s2530_s17 = smov [#allocation8]   ;;  %s2179_s22 = scalar_lea.hbm %s3139_s3, 256 }
  0x1a   :  { %s70_s18 = sshll.u32 %s2530_s17, 4  ;;  %p2180_p8 = scmp.ne.s32.totalorder %s3139_s3, %s2179_s22  ;;  %s71_s18 = int_to_ptr.vmem [resolvable:$true] %s70_s18 }
  0x1b   :  { %p2183_p9 = scmp.lt.u32.totalorder %s2179_s22, %s3139_s3 }
  0x1d   :  { %p2185_p10 = pnand %p2183_p9, %p2180_p8 }
  0x1f   :  { %2188 = shalt.err (!%p2185_p10)
}
  0x20   :  { %s2189_s27 = scalar_lea.vmem %s71_s18, 256  ;;  %p2194_p12 = scmp.lt.s32.totalorder %s71_s18, %s71_s18 }
  0x21   :  { %p2190_p11 = scmp.ne.s32.totalorder %s71_s18, %s2189_s27  ;;  %p2195_p13 = scmp.lt.s32.totalorder %s2189_s27, %s2189_s27 }
  0x23   :  { %p2196_p0 = por %p2195_p13, %p2194_p12 }
  0x25   :  { %p2197_p1 = pnand %p2196_p0, %p2190_p11 }
  0x27   :  { %2200 = shalt.err (!%p2197_p1)
}
  0x28   :  { %s2531_s1 = smov 64   ;;  %s2532_s19 = smov 4  }
  0x29   :  { %76 = dma.hbm_to_vmem [thread:$0]  %s3139_s3, 256, %s71_s18, [#allocation9], %s2531_s1, %s2531_s1, %s2532_s19  }
  0x2a   :  { %s2533_s16 = smov [#allocation11]   ;;  %s2534_s20 = smov [#allocation14]  }
  0x2b   :  { %s92_s17 = sshll.u32 %s2533_s16, 4  ;;  %s115_s21 = sshll.u32 %s2534_s20, 4  ;;  %s93_s17 = int_to_ptr.vmem [resolvable:$true] %s92_s17  ;;  %s116_s21 = int_to_ptr.vmem [resolvable:$true] %s115_s21 }
  0x2c   :  { %s2201_s24 = scalar_lea.hbm %s3141_s5, 256 }
  0x2d   :  { %p2202_p2 = scmp.ne.s32.totalorder %s3141_s5, %s2201_s24  ;;  %p2205_p3 = scmp.lt.u32.totalorder %s2201_s24, %s3141_s5 }
  0x2f   :  { %p2207_p4 = pnand %p2205_p3, %p2202_p2 }
  0x31   :  { %2210 = shalt.err (!%p2207_p4)
}
  0x32   :  { %s2211_s3 = scalar_lea.vmem %s93_s17, 256  ;;  %p2216_p6 = scmp.lt.s32.totalorder %s93_s17, %s93_s17 }
  0x33   :  { %p2212_p5 = scmp.ne.s32.totalorder %s93_s17, %s2211_s3  ;;  %p2217_p7 = scmp.lt.s32.totalorder %s2211_s3, %s2211_s3 }
  0x35   :  { %p2218_p8 = por %p2217_p7, %p2216_p6 }
  0x37   :  { %p2219_p9 = pnand %p2218_p8, %p2212_p5 }
  0x39   :  { %2222 = shalt.err (!%p2219_p9)
}
  0x3a   :  { %98 = dma.hbm_to_vmem [thread:$0]  %s3141_s5, 256, %s93_s17, [#allocation12], %s2531_s1, %s2531_s1, %s2532_s19  }
  0x3b   :  { %s2223_s28 = scalar_lea.hbm %s3143_s7, 16 }
  0x3c   :  { %p2224_p10 = scmp.ne.s32.totalorder %s3143_s7, %s2223_s28  ;;  %p2227_p11 = scmp.lt.u32.totalorder %s2223_s28, %s3143_s7 }
  0x3e   :  { %p2229_p12 = pnand %p2227_p11, %p2224_p10 }
  0x40   :  { %2232 = shalt.err (!%p2229_p12)
}
  0x41   :  { %s2233_s25 = scalar_lea.vmem %s116_s21, 16  ;;  %s2237_s26 = scalar_lea.vmem %s116_s21, 32 }
  0x42   :  { %p2234_p13 = scmp.ne.s32.totalorder %s116_s21, %s2233_s25  ;;  %p2238_p0 = scmp.lt.s32.totalorder %s116_s21, %s116_s21 }
  0x43   :  { %p2239_p1 = scmp.lt.s32.totalorder %s2237_s26, %s2233_s25 }
  0x45   :  { %p2240_p2 = por %p2239_p1, %p2238_p0 }
  0x47   :  { %p2241_p3 = pnand %p2240_p2, %p2234_p13 }
  0x49   :  { %2244 = shalt.err (!%p2241_p3)
}
  0x4a   :  { %118 = dma.hbm_to_vmem [thread:$0]  %s3143_s7, 16, %s116_s21, [#allocation15]  }
  0x4b   :  { %s2535_s27 = smov [#allocation17]   ;;  %s2536_s18 = smov [#allocation20]  }
  0x4c   :  { %s134_s3 = sshll.u32 %s2535_s27, 4  ;;  %s156_s29 = sshll.u32 %s2536_s18, 4  ;;  %s135_s3 = int_to_ptr.vmem [resolvable:$true] %s134_s3  ;;  %s2692_s29 = int_to_ptr.vmem [resolvable:$true] %s156_s29 }
  0x4d   :  { %s2245_s28 = scalar_lea.hbm %s3145_s9, 2304 }
  0x4e   :  { %p2246_p4 = scmp.ne.s32.totalorder %s3145_s9, %s2245_s28  ;;  %p2249_p5 = scmp.lt.u32.totalorder %s2245_s28, %s3145_s9 }
  0x50   :  { %p2251_p6 = pnand %p2249_p5, %p2246_p4 }
  0x52   :  { %2254 = shalt.err (!%p2251_p6)
}
  0x53   :  { %s2255_s7 = scalar_lea.vmem %s135_s3, 2304  ;;  %p2260_p8 = scmp.lt.s32.totalorder %s135_s3, %s135_s3 }
  0x54   :  { %p2256_p7 = scmp.ne.s32.totalorder %s135_s3, %s2255_s7  ;;  %p2261_p9 = scmp.lt.s32.totalorder %s2255_s7, %s2255_s7 }
  0x56   :  { %p2262_p10 = por %p2261_p9, %p2260_p8 }
  0x58   :  { %p2263_p11 = pnand %p2262_p10, %p2256_p7 }
  0x5a   :  { %2266 = shalt.err (!%p2263_p11)
}
  0x5b   :  { %140 = dma.hbm_to_vmem [thread:$0]  %s3145_s9, 2304, %s135_s3, [#allocation18], %s2531_s1, %s2531_s1, %s2532_s19  }
  0x5c   :  { %s2267_s17 = scalar_lea.hbm %s3147_s11, 512 }
  0x5d   :  { %p2268_p12 = scmp.ne.s32.totalorder %s3147_s11, %s2267_s17  ;;  %p2271_p13 = scmp.lt.u32.totalorder %s2267_s17, %s3147_s11 }
  0x5f   :  { %p2273_p0 = pnand %p2271_p13, %p2268_p12 }
  0x61   :  { %2276 = shalt.err (!%p2273_p0)
}
  0x62   :  { %s2277_s28 = scalar_lea.vmem %s2692_s29, 512  ;;  %p2282_p2 = scmp.lt.s32.totalorder %s2692_s29, %s2692_s29 }
  0x63   :  { %p2278_p1 = scmp.ne.s32.totalorder %s2692_s29, %s2277_s28  ;;  %p2283_p3 = scmp.lt.s32.totalorder %s2277_s28, %s2277_s28 }
  0x65   :  { %p2284_p4 = por %p2283_p3, %p2282_p2 }
  0x67   :  { %p2285_p5 = pnand %p2284_p4, %p2278_p1 }
  0x69   :  { %2288 = shalt.err (!%p2285_p5)
}
  0x6a   :  { %162 = dma.hbm_to_vmem [thread:$0]  %s3147_s11, 512, %s2692_s29, [#allocation21], %s2531_s1, %s2531_s1, %s2532_s19  }
  0x6b   :  { %s2537_s20 = smov [#allocation23]   ;;  %s2538_s23 = smov [#allocation2]  }
  0x6c   :  { %s179_s22 = sshll.u32 %s2537_s20, 4  ;;  %s34_s24 = sshll.u32 %s2538_s23, 4  ;;  %s180_s22 = int_to_ptr.vmem [resolvable:$true] %s179_s22  ;;  %s2729_s24 = int_to_ptr.vmem [resolvable:$true] %s34_s24 }
  0x6d   :  { %s2289_s25 = scalar_lea.hbm %s3149_s13, 16 }
  0x6e   :  { %p2290_p6 = scmp.ne.s32.totalorder %s3149_s13, %s2289_s25  ;;  %p2293_p7 = scmp.lt.u32.totalorder %s2289_s25, %s3149_s13 }
  0x70   :  { %p2295_p8 = pnand %p2293_p7, %p2290_p6 }
  0x72   :  { %2298 = shalt.err (!%p2295_p8)
}
  0x73   :  { %s2299_s11 = scalar_lea.vmem %s180_s22, 16  ;;  %s2303_s19 = scalar_lea.vmem %s180_s22, 32 }
  0x74   :  { %p2300_p9 = scmp.ne.s32.totalorder %s180_s22, %s2299_s11  ;;  %p2304_p10 = scmp.lt.s32.totalorder %s180_s22, %s180_s22 }
  0x75   :  { %p2305_p11 = scmp.lt.s32.totalorder %s2303_s19, %s2299_s11 }
  0x77   :  { %p2306_p12 = por %p2305_p11, %p2304_p10 }
  0x79   :  { %p2307_p13 = pnand %p2306_p12, %p2300_p9 }
  0x7b   :  { %2310 = shalt.err (!%p2307_p13)
}
  0x7c   :  { %182 = dma.hbm_to_vmem [thread:$0]  %s3149_s13, 16, %s180_s22, [#allocation24]  }
  0x7d   :  { %s2311_s28 = scalar_lea.hbm %s3136_s0, 256 }
  0x7e   :  { %p2312_p0 = scmp.ne.s32.totalorder %s3136_s0, %s2311_s28  ;;  %p2315_p1 = scmp.lt.u32.totalorder %s2311_s28, %s3136_s0 }
  0x80   :  { %p2317_p2 = pnand %p2315_p1, %p2312_p0 }
  0x82   :  { %2320 = shalt.err (!%p2317_p2)
}
  0x83   :  { %s2321_s7 = scalar_lea.vmem %s2729_s24, 256  ;;  %p2326_p4 = scmp.lt.s32.totalorder %s2729_s24, %s2729_s24 }
  0x84   :  { %p2322_p3 = scmp.ne.s32.totalorder %s2729_s24, %s2321_s7  ;;  %p2327_p5 = scmp.lt.s32.totalorder %s2321_s7, %s2321_s7 }
  0x86   :  { %p2328_p6 = por %p2327_p5, %p2326_p4 }
  0x88   :  { %p2329_p7 = pnand %p2328_p6, %p2322_p3 }
  0x8a   :  { %2332 = shalt.err (!%p2329_p7)
}
  0x8b   :  { %s2539_s13 = smov 128   ;;  %s2540_s22 = smov 8  }
  0x8c   :  { %40 = dma.hbm_to_vmem [thread:$0]  %s3136_s0, 256, %s2729_s24, [#allocation3], %s2539_s13, %s2539_s13, %s2540_s22  }
  0x8d   :  { %s2541_s26 = smov [#allocation7]   ;;  %s2542_s17 = smov [#allocation10]  }
  0x8e   :  { %s58_s5 = sshll.u32 %s2541_s26, 4  ;;  %s83_s27 = sshll.u32 %s2542_s17, 4  ;;  %s59_s5 = int_to_ptr.vmem [resolvable:$true] %s58_s5  ;;  %s84_s27 = int_to_ptr.vmem [resolvable:$true] %s83_s27 }
  0x8f   :  { %s2333_s29 = scalar_lea.hbm %s3138_s2, 256 }
  0x90   :  { %p2334_p8 = scmp.ne.s32.totalorder %s3138_s2, %s2333_s29  ;;  %p2337_p9 = scmp.lt.u32.totalorder %s2333_s29, %s3138_s2 }
  0x92   :  { %p2339_p10 = pnand %p2337_p9, %p2334_p8 }
  0x94   :  { %2342 = shalt.err (!%p2339_p10)
}
  0x95   :  { %s2343_s0 = scalar_lea.vmem %s59_s5, 256  ;;  %p2348_p12 = scmp.lt.s32.totalorder %s59_s5, %s59_s5 }
  0x96   :  { %p2344_p11 = scmp.ne.s32.totalorder %s59_s5, %s2343_s0  ;;  %p2349_p13 = scmp.lt.s32.totalorder %s2343_s0, %s2343_s0 }
  0x98   :  { %p2350_p0 = por %p2349_p13, %p2348_p12 }
  0x9a   :  { %p2351_p1 = pnand %p2350_p0, %p2344_p11 }
  0x9c   :  { %2354 = shalt.err (!%p2351_p1)
}
  0x9d   :  { %64 = dma.hbm_to_vmem [thread:$0]  %s3138_s2, 256, %s59_s5, [#allocation6], %s2539_s13, %s2539_s13, %s2540_s22  }
  0x9e   :  { %s2355_s23 = scalar_lea.hbm %s3140_s4, 16 }
  0x9f   :  { %p2356_p2 = scmp.ne.s32.totalorder %s3140_s4, %s2355_s23  ;;  %p2359_p3 = scmp.lt.u32.totalorder %s2355_s23, %s3140_s4 }
  0xa1   :  { %p2361_p4 = pnand %p2359_p3, %p2356_p2 }
  0xa3   :  { %2364 = shalt.err (!%p2361_p4)
}
  0xa4   :  { %s2365_s17 = scalar_lea.vmem %s84_s27, 16  ;;  %s2369_s11 = scalar_lea.vmem %s84_s27, 32 }
  0xa5   :  { %p2366_p5 = scmp.ne.s32.totalorder %s84_s27, %s2365_s17  ;;  %p2370_p6 = scmp.lt.s32.totalorder %s84_s27, %s84_s27 }
  0xa6   :  { %p2371_p7 = scmp.lt.s32.totalorder %s2369_s11, %s2365_s17 }
  0xa8   :  { %p2372_p8 = por %p2371_p7, %p2370_p6 }
  0xaa   :  { %p2373_p9 = pnand %p2372_p8, %p2366_p5 }
  0xac   :  { %2376 = shalt.err (!%p2373_p9)
}
  0xad   :  { %86 = dma.hbm_to_vmem [thread:$0]  %s3140_s4, 16, %s84_s27, [#allocation9]  }
  0xae   :  { %s2543_s19 = smov [#allocation13]   ;;  %s2544_s18 = smov [#allocation16]  }
  0xaf   :  { %s105_s29 = sshll.u32 %s2543_s19, 4  ;;  %s125_s30 = sshll.u32 %s2544_s18, 4  ;;  %s106_s29 = int_to_ptr.vmem [resolvable:$true] %s105_s29  ;;  %s126_s30 = int_to_ptr.vmem [resolvable:$true] %s125_s30 }
  0xb0   :  { %s2377_s0 = scalar_lea.hbm %s3142_s6, 16 }
  0xb1   :  { %p2378_p10 = scmp.ne.s32.totalorder %s3142_s6, %s2377_s0  ;;  %p2381_p11 = scmp.lt.u32.totalorder %s2377_s0, %s3142_s6 }
  0xb3   :  { %p2383_p12 = pnand %p2381_p11, %p2378_p10 }
  0xb5   :  { %2386 = shalt.err (!%p2383_p12)
}
  0xb6   :  { %s2387_s4 = scalar_lea.vmem %s106_s29, 16  ;;  %s2391_s27 = scalar_lea.vmem %s106_s29, 32 }
  0xb7   :  { %p2388_p13 = scmp.ne.s32.totalorder %s106_s29, %s2387_s4  ;;  %p2392_p0 = scmp.lt.s32.totalorder %s106_s29, %s106_s29 }
  0xb8   :  { %p2393_p1 = scmp.lt.s32.totalorder %s2391_s27, %s2387_s4 }
  0xba   :  { %p2394_p2 = por %p2393_p1, %p2392_p0 }
  0xbc   :  { %p2395_p3 = pnand %p2394_p2, %p2388_p13 }
  0xbe   :  { %2398 = shalt.err (!%p2395_p3)
}
  0xbf   :  { %108 = dma.hbm_to_vmem [thread:$0]  %s3142_s6, 16, %s106_s29, [#allocation12]  }
  0xc0   :  { %s2399_s26 = scalar_lea.hbm %s3144_s8, 16 }
  0xc1   :  { %p2400_p4 = scmp.ne.s32.totalorder %s3144_s8, %s2399_s26  ;;  %p2403_p5 = scmp.lt.u32.totalorder %s2399_s26, %s3144_s8 }
  0xc3   :  { %p2405_p6 = pnand %p2403_p5, %p2400_p4 }
  0xc5   :  { %2408 = shalt.err (!%p2405_p6)
}
  0xc6   :  { %s2409_s19 = scalar_lea.vmem %s126_s30, 16  ;;  %s2413_s18 = scalar_lea.vmem %s126_s30, 32 }
  0xc7   :  { %p2410_p7 = scmp.ne.s32.totalorder %s126_s30, %s2409_s19  ;;  %p2414_p8 = scmp.lt.s32.totalorder %s126_s30, %s126_s30 }
  0xc8   :  { %p2415_p9 = scmp.lt.s32.totalorder %s2413_s18, %s2409_s19 }
  0xca   :  { %p2416_p10 = por %p2415_p9, %p2414_p8 }
  0xcc   :  { %p2417_p11 = pnand %p2416_p10, %p2410_p7 }
  0xce   :  { %2420 = shalt.err (!%p2417_p11)
}
  0xcf   :  { %128 = dma.hbm_to_vmem [thread:$0]  %s3144_s8, 16, %s126_s30, [#allocation15]  }
  0xd0   :  { %s2545_s16 = smov [#allocation19]   ;;  %s2546_s0 = smov [#allocation22]  }
  0xd1   :  { %s147_s28 = sshll.u32 %s2545_s16, 4  ;;  %s169_s24 = sshll.u32 %s2546_s0, 4  ;;  %s148_s28 = int_to_ptr.vmem [resolvable:$true] %s147_s28  ;;  %s170_s24 = int_to_ptr.vmem [resolvable:$true] %s169_s24 }
  0xd2   :  { %s2421_s20 = scalar_lea.hbm %s3146_s10, 16 }
  0xd3   :  { %p2422_p12 = scmp.ne.s32.totalorder %s3146_s10, %s2421_s20  ;;  %p2425_p13 = scmp.lt.u32.totalorder %s2421_s20, %s3146_s10 }
  0xd5   :  { %p2427_p0 = pnand %p2425_p13, %p2422_p12 }
  0xd7   :  { %2430 = shalt.err (!%p2427_p0)
}
  0xd8   :  { %s2431_s8 = scalar_lea.vmem %s148_s28, 16  ;;  %s2435_s30 = scalar_lea.vmem %s148_s28, 32 }
  0xd9   :  { %p2432_p1 = scmp.ne.s32.totalorder %s148_s28, %s2431_s8  ;;  %p2436_p2 = scmp.lt.s32.totalorder %s148_s28, %s148_s28 }
  0xda   :  { %p2437_p3 = scmp.lt.s32.totalorder %s2435_s30, %s2431_s8 }
  0xdc   :  { %p2438_p4 = por %p2437_p3, %p2436_p2 }
  0xde   :  { %p2439_p5 = pnand %p2438_p4, %p2432_p1 }
  0xe0   :  { %2442 = shalt.err (!%p2439_p5)
}
  0xe1   :  { %150 = dma.hbm_to_vmem [thread:$0]  %s3146_s10, 16, %s148_s28, [#allocation18]  }
  0xe2   :  { %s2443_s11 = scalar_lea.hbm %s3148_s12, 16 }
  0xe3   :  { %p2444_p6 = scmp.ne.s32.totalorder %s3148_s12, %s2443_s11  ;;  %p2447_p7 = scmp.lt.u32.totalorder %s2443_s11, %s3148_s12 }
  0xe5   :  { %p2449_p8 = pnand %p2447_p7, %p2444_p6 }
  0xe7   :  { %2452 = shalt.err (!%p2449_p8)
}
  0xe8   :  { %s2453_s6 = scalar_lea.vmem %s170_s24, 16  ;;  %s2457_s29 = scalar_lea.vmem %s170_s24, 32 }
  0xe9   :  { %p2454_p9 = scmp.ne.s32.totalorder %s170_s24, %s2453_s6  ;;  %p2458_p10 = scmp.lt.s32.totalorder %s170_s24, %s170_s24 }
  0xea   :  { %p2459_p11 = scmp.lt.s32.totalorder %s2457_s29, %s2453_s6 }
  0xec   :  { %p2460_p12 = por %p2459_p11, %p2458_p10 }
  0xee   :  { %p2461_p13 = pnand %p2460_p12, %p2454_p9 }
  0xf0   :  { %2464 = shalt.err (!%p2461_p13)
}
  0xf1   :  { %172 = dma.hbm_to_vmem [thread:$0]  %s3148_s12, 16, %s170_s24, [#allocation21]  }
  0xf2   :  { %s2547_s28 = smov [#allocation25]   ;;  %s2465_s20 = scalar_lea.hbm %s3150_s14, 16 }
  0xf3   :  { %s189_s0 = sshll.u32 %s2547_s28, 4  ;;  %p2466_p0 = scmp.ne.s32.totalorder %s3150_s14, %s2465_s20  ;;  %s190_s0 = int_to_ptr.vmem [resolvable:$true] %s189_s0 }
  0xf4   :  { %p2469_p1 = scmp.lt.u32.totalorder %s2465_s20, %s3150_s14 }
  0xf6   :  { %p2471_p2 = pnand %p2469_p1, %p2466_p0 }
  0xf8   :  { %2474 = shalt.err (!%p2471_p2)
}
  0xf9   :  { %s2475_s8 = scalar_lea.vmem %s190_s0, 16  ;;  %s2479_s12 = scalar_lea.vmem %s190_s0, 32 }
  0xfa   :  { %p2476_p3 = scmp.ne.s32.totalorder %s190_s0, %s2475_s8  ;;  %p2480_p4 = scmp.lt.s32.totalorder %s190_s0, %s190_s0 }
  0xfb   :  { %p2481_p5 = scmp.lt.s32.totalorder %s2479_s12, %s2475_s8 }
  0xfd   :  { %p2482_p6 = por %p2481_p5, %p2480_p4 }
  0xff   :  { %p2483_p7 = pnand %p2482_p6, %p2476_p3 }
 0x101   :  { %2486 = shalt.err (!%p2483_p7)
}
 0x102   :  { %192 = dma.hbm_to_vmem [thread:$0]  %s3150_s14, 16, %s190_s0, [#allocation24]  }
 0x103   :  { %2509 = dma.done.wait [#allocation3], 256  }
 0x104   :  { %2510 = vsyncadd [#allocation3], 4294967040 }
 0x105   :  { %2511 = dma.done.wait [#allocation6], 288  }
 0x106   :  { %2512 = vsyncadd [#allocation6], 4294967008 }
 0x107   :  { %2513 = dma.done.wait [#allocation9], 272  }
 0x108   :  { %2514 = vsyncadd [#allocation9], 4294967024 }
 0x109   :  { %2515 = dma.done.wait [#allocation12], 272  }
 0x10a   :  { %2516 = vsyncadd [#allocation12], 4294967024 }
 0x10b   :  { %2517 = dma.done.wait [#allocation15], 32  }
 0x10c   :  { %2518 = vsyncadd [#allocation15], 4294967264 }
 0x10d   :  { %2519 = dma.done.wait [#allocation18], 2320  }
 0x10e   :  { %2520 = vsyncadd [#allocation18], 4294964976 }
 0x10f   :  { %2521 = dma.done.wait [#allocation21], 528  }
 0x110   :  { %2522 = vsyncadd [#allocation21], 4294966768 }
 0x111   :  { %2523 = dma.done.wait [#allocation24], 32  }
 0x112   :  { %2524 = vsyncadd [#allocation24], 4294967264  ;;  %v2548_v0 = vmov 0.0   ;;  %vm2549_vm0 = vmmov 0   ;;  %v2107_v1 = vld [vmem:[#allocation8] sm:$0xff]   ;;  %v2108_v2 = vld [vmem:[#allocation8 + $0x8] sm:$0xff]  }
 0x113   :  { %1923 = vmatprep.subr.bf16.mxu0 %v2548_v0  ;;  %1927 = vmatprep.mubr.msk.bf16.mxu0 %vm2549_vm0, %v2548_v0  ;;  %v2856_v3 = vld [vmem:[#allocation2] sm:$0xff]  ;;  %v2858_v4 = vld [vmem:[#allocation2 + $0x8] sm:$0xff]  ;;  %vm269_vm1 = vcmask 261120   ;;  %v1813_v6 = vld [vmem:[#allocation10] ss:$0 sm:$0xff]  ;;  %s2550_s14 = smov 96  }
 0x114   :  { %1931 = vmatprep.subr.bf16.mxu1 %v2548_v0  ;;  %1933 = vmatprep.mubr.msk.bf16.mxu1 %vm2549_vm0, %v2548_v0  ;;  %v245_v5 = vpack.c.bf16 %v2858_v4, %v2856_v3  ;;  %vm331_vm2 = vcmask 130048   ;;  %v2885_v19 = vld [vmem:[#allocation5] ss:$0 sm:$0xff]  ;;  %vm427_vm3 = vcmask 64512   ;;  %v2888_v24 = vld [vmem:[#allocation5 + $0x1] ss:$0 sm:$0xff] }
 0x115   :  { %1924 = vmatpush3.bf16.msra.mxu0 %v2107_v1  ;;  %s2551_s21 = smov 80   ;;  %vm457_vm4 = vcmask 1043456   ;;  %s2553_s25 = smov 48  }
 0x116   :  { %1925 = vmatprep.subr.bf16.mxu0 %v2548_v0  ;;  %s3153_s26 = smov 16   ;;  %s2555_s17 = smov [#allocation26]  }
 0x117   :  { %s1794_s11 = sshll.u32 %s2555_s17, 4  ;;  %s1795_s11 = int_to_ptr.vmem [resolvable:$true] %s1794_s11 }
 0x118   :  { %s2487_s2 = scalar_lea.vmem %s1795_s11, 256  ;;  %p2492_p9 = scmp.lt.s32.totalorder %s1795_s11, %s1795_s11 }
 0x119   :  { %1926 = vmatpush3.bf16.msra.mxu0 %v2108_v2  ;;  %p2488_p8 = scmp.ne.s32.totalorder %s1795_s11, %s2487_s2  ;;  %p2493_p10 = scmp.lt.s32.totalorder %s2487_s2, %s2487_s2 }
 0x11a   :  { %1937 = vmatprep.subr.bf16.mxu0 %v2548_v0 }
 0x11b   :  { %p2494_p11 = por %p2493_p10, %p2492_p9 }
 0x11c   :  { %1928 = vmatmul.mubr.msk.bf16.vlgmr.msra.gmra.mrb[0].mxu0 %vm269_vm1, %v245_v5 }
 0x11d   :  { %1939 = vmatprep.mubr.msk.bf16.mxu0 %vm2549_vm0, %v2548_v0  ;;  %p2495_p12 = pnand %p2494_p11, %p2488_p8 }
 0x1ef   :  { %v307_v7 = vpop.f32.mrb[0].mxu0 }
 0x1f0   :  { %v308_v8 = vadd.f32 %v1813_v6, %v307_v7  ;;  %v1929_v9 = vpop.f32.mrb[1].mxu0 }
 0x1f1   :  { %v310_v10 = vpop.f32.mrb[2].mxu0 }
 0x1f2   :  { %v2867_v11 = vpack.c.bf16 %v308_v8, %v308_v8  ;;  %v311_v12 = vadd.f32 %v1813_v6, %v310_v10  ;;  %v1930_v13 = vpop.f32.mrb[3].mxu0 }
 0x1f4   :  { %329 = vrot.lane.b32.xlu0 %v2867_v11, %s2550_s14  ;;  %v2870_v14 = vpack.c.bf16 %v311_v12, %v311_v12 }
 0x1f8   :  { %379 = vrot.lane.b32.xlu0 %v2870_v14, %s2550_s14 }
 0x266   :  { %v330_v15 = vpop.permute.xlu0 %329 }
 0x267   :  { %v336_v16 = vsel %vm331_vm2, %v330_v15, 0 }
 0x268   :  { %1932 = vmatpush3.bf16.xpose.msra.mxu1 %v336_v16 }
 0x269   :  { %1943 = vmatprep.subr.bf16.mxu1 %v2548_v0 }
 0x26a   :  { %v380_v17 = vpop.permute.xlu0 %379 }
 0x26b   :  { %v385_v18 = vsel %vm331_vm2, %v380_v17, 0 }
 0x26c   :  { %1938 = vmatpush3.bf16.xpose.msra.mxu0 %v385_v18 }
 0x26d   :  { %1949 = vmatprep.subr.bf16.mxu0 %v2548_v0 }
 0x26f   :  { %1934 = vmatmul.mubr.msk.bf16.vlgmr.msra.gmra.mrb[0].mxu1 %vm331_vm2, %v2867_v11 }
 0x270   :  { %1945 = vmatprep.mubr.msk.bf16.mxu1 %vm2549_vm0, %v2548_v0 }
 0x273   :  { %1940 = vmatmul.mubr.msk.bf16.vlgmr.msra.gmra.mrb[4].mxu0 %vm331_vm2, %v2870_v14 }
 0x274   :  { %1951 = vmatprep.mubr.msk.bf16.mxu0 %vm2549_vm0, %v2548_v0 }
 0x342   :  { %v372_v20 = vpop.f32.mrb[0].mxu1 }
 0x343   :  { %v373_v21 = vadd.f32 %v2885_v19, %v372_v20  ;;  %v1935_v22 = vpop.f32.mrb[1].mxu1 }
 0x344   :  { %v375_v23 = vpop.f32.mrb[2].mxu1 }
 0x345   :  { %v1936_v25 = vpop.f32.mrb[3].mxu1  ;;  %v428_v26 = vsel %vm427_vm3, %v373_v21, -inf }
 0x346   :  { %429 = vmax.xlane.f32.xlu1 %v428_v26  ;;  %v421_v27 = vpop.f32.mrb[4].mxu0 }
 0x347   :  { %v422_v28 = vadd.f32 %v2888_v24, %v421_v27  ;;  %v1941_v29 = vpop.f32.mrb[5].mxu0 }
 0x348   :  { %v424_v30 = vpop.f32.mrb[6].mxu0 }
 0x349   :  { %v1942_v31 = vpop.f32.mrb[7].mxu0  ;;  %v431_v32 = vsel %vm427_vm3, %v422_v28, -inf }
 0x34a   :  { %432 = vmax.xlane.f32.xlu1 %v431_v32 }
 0x35b   :  { %452 = vrot.lane.b32.xlu1 %v2867_v11, %s2531_s1 }
 0x35f   :  { %501 = vrot.lane.b32.xlu1 %v2870_v14, %s2531_s1  ;;  %s2552_s1 = smov 112  }
 0x363   :  { %551 = vrot.lane.b32.xlu1 %v2867_v11, %s2551_s21 }
 0x3d3   :  { %v430_v33 = vpop.xlane.xlu1 %429 }
 0x3d4   :  { %v434_v34 = vsub.f32 %v373_v21, %v430_v33 }
 0x3d6   :  { %v436_v35 = vmul.f32 1.442695, %v434_v34 }
 0x3d7   :  { %v433_v36 = vpop.xlane.xlu1 %432 }
 0x3d8   :  { %2133 = vpow2.f32 %v436_v35  ;;  %v435_v37 = vsub.f32 %v422_v28, %v433_v36 }
 0x3da   :  { %v438_v38 = vmul.f32 1.442695, %v435_v37 }
 0x3db   :  { %v453_v39 = vpop.permute.xlu1 %452 }
 0x3dc   :  { %2135 = vpow2.f32 %v438_v38  ;;  %v459_v40 = vsel %vm457_vm4, %v453_v39, 0 }
 0x3dd   :  { %1944 = vmatpush3.bf16.msra.mxu1 %v459_v40 }
 0x3de   :  { %1955 = vmatprep.subr.bf16.mxu1 %v2548_v0 }
 0x3df   :  { %v502_v41 = vpop.permute.xlu1 %501 }
 0x3e0   :  { %v507_v42 = vsel %vm457_vm4, %v502_v41, 0 }
 0x3e1   :  { %1950 = vmatpush3.bf16.msra.mxu0 %v507_v42  ;;  %v2109_v42 = vld [vmem:[#allocation11] sm:$0xff]  }
 0x3e2   :  { %v2134_v43 = vpop.eup %2133  ;;  %1961 = vmatprep.subr.bf16.mxu0 %v2548_v0 }
 0x3e3   :  { %v440_v44 = vsel %vm427_vm3, %v2134_v43, 0.0  ;;  %v552_v47 = vpop.permute.xlu1 %551 }
 0x3e4   :  { %441 = vadd.xlane.f32.xlu0 %v440_v44  ;;  %v557_v54 = vsel %vm331_vm2, %v552_v47, 0 }
 0x3e6   :  { %v2136_v45 = vpop.eup %2135 }
 0x3e7   :  { %v443_v46 = vsel %vm427_vm3, %v2136_v45, 0.0 }
 0x3e8   :  { %444 = vadd.xlane.f32.xlu1 %v443_v46 }
 0x3f9   :  { %601 = vrot.lane.b32.xlu1 %v2870_v14, %s2551_s21 }
 0x3fa   :  { %549 = vrot.lane.b32.xlu0 %v2867_v11, %s2552_s1 }
 0x3fd   :  { %599 = vrot.lane.b32.xlu1 %v2870_v14, %s2552_s1 }
 0x471   :  { %v442_v48 = vpop.xlane.xlu0 %441 }
 0x472   :  { %2137 = vrcp.f32 %v442_v48 }
 0x475   :  { %v445_v49 = vpop.xlane.xlu1 %444  ;;  %v550_v59 = vpop.permute.xlu0 %549 }
 0x476   :  { %2139 = vrcp.f32 %v445_v49 }
 0x479   :  { %v602_v56 = vpop.permute.xlu1 %601 }
 0x47a   :  { %v607_v58 = vsel %vm331_vm2, %v602_v56, 0 }
 0x47c   :  { %v2138_v50 = vpop.eup %2137 }
 0x47d   :  { %v448_v51 = vmul.f32 %v2138_v50, %v2134_v43  ;;  %v600_v60 = vpop.permute.xlu1 %599  ;;  %v2110_v43 = vld [vmem:[#allocation11 + $0x8] sm:$0xff]  }
 0x47f   :  { %v450_v52 = vpack.c.bf16 %v448_v51, %v448_v51 }
 0x480   :  { %v2140_v53 = vpop.eup %2139 }
 0x481   :  { %v449_v55 = vmul.f32 %v2140_v53, %v2136_v45  ;;  %1946 = vmatmul.mubr.msk.bf16.vlgmr.msra.gmra.mrb[4].mxu1 %vm427_vm3, %v450_v52 }
 0x482   :  { %1956 = vmatpush3.bf16.xpose.msra.mxu1 %v557_v54  ;;  %1957 = vmatprep.mubr.msk.bf16.mxu1 %vm2549_vm0, %v2548_v0 }
 0x483   :  { %v451_v57 = vpack.c.bf16 %v449_v55, %v449_v55  ;;  %1967 = vmatprep.subr.bf16.mxu1 %v2548_v0 }
 0x485   :  { %1952 = vmatmul.mubr.msk.bf16.vlgmr.msra.gmra.mrb[8].mxu0 %vm427_vm3, %v451_v57 }
 0x486   :  { %1962 = vmatpush3.bf16.xpose.msra.mxu0 %v607_v58  ;;  %1963 = vmatprep.mubr.msk.bf16.mxu0 %vm2549_vm0, %v2548_v0 }
 0x487   :  { %1973 = vmatprep.subr.bf16.mxu0 %v2548_v0 }
 0x489   :  { %1958 = vmatmul.mubr.msk.bf16.vlgmr.msra.gmra.mrb[8].mxu1 %vm331_vm2, %v550_v59  ;;  %v2554_v59 = vmov 0  }
 0x48a   :  { %1969 = vmatprep.mubr.msk.bf16.mxu1 %vm2549_vm0, %v2548_v0  ;;  %2106 = vset.pattern.permute.xlu1 %v2554_v59 }
 0x48b   :  { %2105 = vset.pattern.permute.xlu0 %v2554_v59 }
 0x48d   :  { %1964 = vmatmul.mubr.msk.bf16.vlgmr.msra.gmra.mrb[12].mxu0 %vm331_vm2, %v600_v60  ;;  %v1827_v60 = vld [vmem:[#allocation13] ss:$0 sm:$0xff] }
 0x48e   :  { %1975 = vmatprep.mubr.msk.bf16.mxu0 %vm2549_vm0, %v2548_v0 }
 0x554   :  { %v2923_v61 = vpop.f32.mrb[4].mxu1 }
 0x555   :  { %v1947_v62 = vpop.f32.mrb[5].mxu1 }
 0x556   :  { %v498_v63 = vpop.f32.mrb[6].mxu1 }
 0x557   :  { %v1948_v1 = vpop.f32.mrb[7].mxu1 }
 0x558   :  { %v2925_v2 = vpop.f32.mrb[8].mxu0 }
 0x559   :  { %v1953_v5 = vpop.f32.mrb[9].mxu0 }
 0x55a   :  { %v546_v6 = vpop.f32.mrb[10].mxu0 }
 0x55b   :  { %v1954_v7 = vpop.f32.mrb[11].mxu0 }
 0x55c   :  { %v593_v8 = vpop.f32.mrb[8].mxu1 }
 0x55d   :  { %v594_v9 = vadd.f32 %v2885_v19, %v593_v8  ;;  %v1959_v10 = vpop.f32.mrb[9].mxu1 }
 0x55e   :  { %v596_v12 = vpop.f32.mrb[10].mxu1 }
 0x55f   :  { %v1960_v13 = vpop.f32.mrb[11].mxu1  ;;  %v649_v15 = vsel %vm427_vm3, %v594_v9, -inf }
 0x560   :  { %650 = vmax.xlane.f32.xlu1 %v649_v15  ;;  %v643_v16 = vpop.f32.mrb[12].mxu0 }
 0x561   :  { %v644_v17 = vadd.f32 %v2888_v24, %v643_v16  ;;  %v1965_v18 = vpop.f32.mrb[13].mxu0  ;;  %v244_v16 = vld [vmem:[#allocation7 + $0x8] sm:$0xff] }
 0x562   :  { %v646_v20 = vpop.f32.mrb[14].mxu0  ;;  %v2113_v18 = vld [vmem:[#allocation17 + $0x18] sm:$0xff]  }
 0x563   :  { %v1966_v21 = vpop.f32.mrb[15].mxu0  ;;  %v652_v22 = vsel %vm427_vm3, %v644_v17, -inf  ;;  %v2114_v20 = vld [vmem:[#allocation17 + $0x8] sm:$0xff]  }
 0x564   :  { %653 = vmax.xlane.f32.xlu0 %v652_v22 }
 0x57a   :  { %721 = vrot.lane.b32.xlu0 %v2870_v14, %s2553_s25 }
 0x5ed   :  { %v651_v23 = vpop.xlane.xlu1 %650 }
 0x5ee   :  { %v655_v19 = vsub.f32 %v594_v9, %v651_v23 }
 0x5f0   :  { %v657_v25 = vmul.f32 1.442695, %v655_v19 }
 0x5f1   :  { %v654_v26 = vpop.xlane.xlu0 %653 }
 0x5f2   :  { %2141 = vpow2.f32 %v657_v25  ;;  %v656_v27 = vsub.f32 %v644_v17, %v654_v26  ;;  %v2111_v17 = vld [vmem:[#allocation17 + $0x10] sm:$0xff]  }
 0x5f4   :  { %v659_v28 = vmul.f32 1.442695, %v656_v27 }
 0x5f5   :  { %v722_v29 = vpop.permute.xlu0 %721 }
 0x5f6   :  { %2143 = vpow2.f32 %v659_v28  ;;  %v727_v24 = vsel %vm457_vm4, %v722_v29, 0 }
 0x5f7   :  { %1974 = vmatpush3.bf16.msra.mxu0 %v727_v24 }
 0x5f8   :  { %1987 = vmatprep.subr.bf16.mxu0 %v2548_v0 }
 0x5fc   :  { %v2142_v30 = vpop.eup %2141 }
 0x5fd   :  { %v661_v31 = vsel %vm427_vm3, %v2142_v30, 0.0 }
 0x5fe   :  { %662 = vadd.xlane.f32.xlu1 %v661_v31 }
 0x600   :  { %v2144_v32 = vpop.eup %2143 }
 0x601   :  { %v664_v14 = vsel %vm427_vm3, %v2144_v32, 0.0 }
 0x602   :  { %665 = vadd.xlane.f32.xlu1 %v664_v14 }
 0x613   :  { %673 = vrot.lane.b32.xlu1 %v2867_v11, %s2553_s25 }
 0x68b   :  { %v663_v33 = vpop.xlane.xlu1 %662 }
 0x68c   :  { %2145 = vrcp.f32 %v663_v33  ;;  %v910_v33 = vlaneseq }
 0x68f   :  { %v666_v34 = vpop.xlane.xlu1 %665 }
 0x690   :  { %2147 = vrcp.f32 %v666_v34  ;;  %v2965_v34 = vshrl.u32 %v910_v33, 7 }
 0x692   :  { %vm961_vm5 = vcmp.lt.s32.totalorder %v2965_v34, 3  ;;  %vm939_vm7 = vcmp.lt.s32.totalorder %v2965_v34, 4  ;;  %vm1096_vm11 = vcmp.lt.s32.totalorder %v2965_v34, 2  ;;  %vm1177_vm12 = vcmp.lt.s32.totalorder %v2965_v34, 1 }
 0x693   :  { %v674_v35 = vpop.permute.xlu1 %673 }
 0x694   :  { %v679_v36 = vsel %vm457_vm4, %v674_v35, 0 }
 0x695   :  { %1968 = vmatpush3.bf16.msra.mxu1 %v679_v36 }
 0x696   :  { %v2146_v37 = vpop.eup %2145  ;;  %1979 = vmatprep.subr.bf16.mxu1 %v2548_v0 }
 0x697   :  { %v669_v38 = vmul.f32 %v2146_v37, %v2142_v30  ;;  %v1831_v37 = vld [vmem:[#allocation14] ss:$0 sm:$0xff] }
 0x699   :  { %v671_v39 = vpack.c.bf16 %v669_v38, %v669_v38 }
 0x69a   :  { %v2148_v40 = vpop.eup %2147 }
 0x69b   :  { %v670_v41 = vmul.f32 %v2148_v40, %v2144_v32  ;;  %1970 = vmatmul.mubr.msk.bf16.vlgmr.msra.gmra.mrb[12].mxu1 %vm427_vm3, %v671_v39 }
 0x69c   :  { %1983 = vmatprep.mubr.msk.bf16.mxu1 %vm2549_vm0, %v2548_v0  ;;  %1980 = vmatpush3.bf16.msra.mxu1 %v2109_v42 }
 0x69d   :  { %v672_v11 = vpack.c.bf16 %v670_v41, %v670_v41  ;;  %1981 = vmatprep.subr.bf16.mxu1 %v2548_v0  ;;  %v1832_v41 = vld [vmem:[#allocation16] ss:$0 sm:$0xff] }
 0x69f   :  { %1976 = vmatmul.mubr.msk.bf16.vlgmr.msra.gmra.mrb[16].mxu0 %vm427_vm3, %v672_v11  ;;  %v912_v11 = vadd.s32 8, %v2965_v34  ;;  %vm1322_vm3 = vcmp.lt.s32.totalorder %v2965_v34, 7 }
 0x6a0   :  { %1991 = vmatprep.mubr.msk.bf16.mxu0 %vm2549_vm0, %v2548_v0  ;;  %1982 = vmatpush3.bf16.msra.mxu1 %v2110_v43 }
 0x6a1   :  { %1995 = vmatprep.subr.bf16.mxu1 %v2548_v0  ;;  %1988 = vmatpush3.bf16.msra.mxu0 %v2111_v17  ;;  %v2117_v17 = vld [vmem:[#allocation17 + $0x28] sm:$0xff]  }
 0x6a2   :  { %1989 = vmatprep.subr.bf16.mxu0 %v2548_v0 }
 0x6a5   :  { %1990 = vmatpush3.bf16.msra.mxu0 %v2113_v18 }
 0x6a6   :  { %2003 = vmatprep.subr.bf16.mxu0 %v2548_v0 }
 0x76e   :  { %v715_v44 = vpop.f32.mrb[12].mxu1 }
 0x76f   :  { %v1971_v45 = vpop.f32.mrb[13].mxu1 }
 0x770   :  { %v718_v46 = vpop.f32.mrb[14].mxu1 }
 0x771   :  { %v1972_v47 = vpop.f32.mrb[15].mxu1 }
 0x772   :  { %v763_v48 = vpop.f32.mrb[16].mxu0  ;;  %v2971_v47 = vand.u32 7, %v2965_v34 }
 0x773   :  { %v2100_v49 = vpack.i.bf16 %v763_v48, %v715_v44  ;;  %v1977_v50 = vpop.f32.mrb[17].mxu0 }
 0x774   :  { %v766_v51 = vpop.f32.mrb[18].mxu0  ;;  %vm964_vm6 = vcmp.ge.s32.totalorder %v2971_v47, 3  ;;  %vm942_vm9 = vcmp.ge.s32.totalorder %v2971_v47, 4  ;;  %vm1099_vm13 = vcmp.ge.s32.totalorder %v2971_v47, 2  ;;  %vm1180_vm15 = vcmp.ge.s32.totalorder %v2971_v47, 1 }
 0x775   :  { %2101 = vrot.lane.b32.xlu1 %v2100_v49, %s3153_s26  ;;  %v1978_v52 = vpop.f32.mrb[19].mxu0  ;;  %v2975_v49 = vand.u32 7, %v912_v11  ;;  %vm1327_vm4 = vcmp.lt.s32.totalorder %v2971_v47, 7 }
 0x777   :  { %vm965_vm8 = vcmp.ge.s32.totalorder %v2975_v49, 3  ;;  %vm943_vm10 = vcmp.ge.s32.totalorder %v2975_v49, 4  ;;  %vm1100_vm14 = vcmp.ge.s32.totalorder %v2975_v49, 2 }
 0x7e7   :  { %v2102_v53 = vpop.permute.xlu1 %2101 }
 0x7e8   :  { %v2104_v54 = vunpack.i.h.bf16 %v2102_v53  ;;  %v2103_v55 = vunpack.i.l.bf16 %v2102_v53 }
 0x7ea   :  { %v778_v56 = vsel %vm331_vm2, %v2925_v2, %v2104_v54  ;;  %v777_v57 = vsel %vm331_vm2, %v2923_v61, %v2103_v55  ;;  %vm1181_vm2 = vcmp.ge.s32.totalorder %v2975_v49, 1 }
 0x7eb   :  { %v779_v58 = vpack.c.bf16 %v778_v56, %v777_v57 }
 0x7ed   :  { %1984 = vmatmul.mubr.msk.bf16.vlgmr.msra.gmra.mrb[16].mxu1 %vm269_vm1, %v779_v58 }
 0x7ee   :  { %1999 = vmatprep.mubr.msk.bf16.mxu1 %vm2549_vm0, %v2548_v0 }
 0x8c0   :  { %v840_v62 = vpop.f32.mrb[16].mxu1 }
 0x8c1   :  { %v841_v63 = vadd.f32 %v1827_v60, %v840_v62  ;;  %v1985_v1 = vpop.f32.mrb[17].mxu1 }
 0x8c2   :  { %v843_v5 = vpop.f32.mrb[18].mxu1 }
 0x8c3   :  { %v847_v6 = vadd.f32 %v841_v63, %v2856_v3  ;;  %v844_v2 = vadd.f32 %v1827_v60, %v843_v5  ;;  %v1986_v7 = vpop.f32.mrb[19].mxu1  ;;  %v243_v3 = vld [vmem:[#allocation7] sm:$0xff] }
 0x8c5   :  { %v848_v61 = vadd.f32 %v844_v2, %v2858_v4  ;;  %v851_v8 = vsel %vm269_vm1, %v847_v6, 0.0  ;;  %v860_v12 = vmul.f32 %v847_v6, %v847_v6  ;;  %v2112_v4 = vld [vmem:[#allocation17] sm:$0xff]  }
 0x8c6   :  { %852 = vadd.xlane.f32.xlu1 %v851_v8  ;;  %1996 = vmatpush3.bf16.msra.mxu1 %v2112_v4  ;;  %v2116_v8 = vld [vmem:[#allocation17 + $0x30] sm:$0xff]   ;;  %v2118_v4 = vld [vmem:[#allocation17 + $0x38] sm:$0xff]  }
 0x8c7   :  { %v854_v9 = vsel %vm269_vm1, %v848_v61, 0.0  ;;  %v861_v10 = vmul.f32 %v848_v61, %v848_v61  ;;  %v862_v15 = vsel %vm269_vm1, %v860_v12, 0.0  ;;  %1997 = vmatprep.subr.bf16.mxu1 %v2548_v0 }
 0x8c8   :  { %855 = vadd.xlane.f32.xlu0 %v854_v9 }
 0x8c9   :  { %v865_v13 = vsel %vm269_vm1, %v861_v10, 0.0 }
 0x8ca   :  { %866 = vadd.xlane.f32.xlu1 %v865_v13  ;;  %1998 = vmatpush3.bf16.msra.mxu1 %v2114_v20 }
 0x8cb   :  { %2011 = vmatprep.subr.bf16.mxu1 %v2548_v0 }
 0x8cc   :  { %863 = vadd.xlane.f32.xlu0 %v862_v15 }
 0x8db   :  { %905 = vperm.xlu1 %2106, %v244_v16  }
 0x8e2   :  { %900 = vperm.xlu0 %2105, %v243_v3  }
 0x953   :  { %v853_v21 = vpop.xlane.xlu1 %852 }
 0x954   :  { %v858_v23 = vmul.f32 0.03125, %v853_v21 }
 0x955   :  { %v856_v22 = vpop.xlane.xlu0 %855 }
 0x956   :  { %v859_v19 = vmul.f32 0.03125, %v856_v22  ;;  %v870_v29 = vmul.f32 %v858_v23, %v858_v23  ;;  %v874_v38 = vsub.f32 %v847_v6, %v858_v23 }
 0x957   :  { %v867_v25 = vpop.xlane.xlu1 %866 }
 0x958   :  { %v871_v26 = vmul.f32 %v859_v19, %v859_v19  ;;  %v869_v27 = vmul.f32 0.03125, %v867_v25  ;;  %v875_v35 = vsub.f32 %v848_v61, %v859_v19  ;;  %v2115_v61 = vld [vmem:[#allocation17 + $0x20] sm:$0xff]   ;;  %v2120_v25 = vld [vmem:[#allocation17 + $0x50] sm:$0xff]  }
 0x959   :  { %v864_v28 = vpop.xlane.xlu0 %863  ;;  %v2119_v19 = vld [vmem:[#allocation17 + $0x40] sm:$0xff]  }
 0x95a   :  { %v873_v24 = vsub.f32 %v869_v27, %v871_v26  ;;  %v868_v30 = vmul.f32 0.03125, %v864_v28 }
 0x95b   :  { %v2968_v44 = vpop.permute.xlu1 %905 }
 0x95c   :  { %v877_v31 = vadd.f32 1e-05, %v873_v24  ;;  %v872_v32 = vsub.f32 %v868_v30, %v870_v29  ;;  %v2121_v30 = vld [vmem:[#allocation17 + $0x48] sm:$0xff]  }
 0x95e   :  { %2149 = vrsqrt.f32 %v877_v31  ;;  %v876_v14 = vadd.f32 1e-05, %v872_v32  ;;  %v2122_v31 = vld [vmem:[#allocation17 + $0x58] sm:$0xff]  }
 0x960   :  { %2151 = vrsqrt.f32 %v876_v14 }
 0x961   :  { %v2973_v48 = vpop.permute.xlu0 %900 }
 0x968   :  { %v2150_v36 = vpop.eup %2149 }
 0x969   :  { %v881_v39 = vmul.f32 %v2150_v36, %v875_v35  ;;  %v2123_v36 = vld [vmem:[#allocation17 + $0x60] sm:$0xff]  }
 0x96a   :  { %v2152_v40 = vpop.eup %2151 }
 0x96b   :  { %v889_v42 = vmul.f32 %v1831_v37, %v881_v39  ;;  %v880_v43 = vmul.f32 %v2152_v40, %v874_v38 }
 0x96d   :  { %v897_v45 = vadd.f32 %v1832_v41, %v889_v42  ;;  %v888_v46 = vmul.f32 %v1831_v37, %v880_v43  ;;  %v2124_v37 = vld [vmem:[#allocation17 + $0x70] sm:$0xff]  }
 0x96f   :  { %v2978_v50 = vmul.f32 %v2968_v44, %v897_v45  ;;  %v896_v51 = vadd.f32 %v1832_v41, %v888_v46  ;;  %v2125_v46 = vld [vmem:[#allocation17 + $0x68] sm:$0xff]  }
 0x971   :  { %v2981_v52 = vmul.f32 %v2973_v48, %v896_v51  ;;  %v960_v54 = vrot.slane %v2978_v50, 5  ;;  %v938_v56 = vrot.slane %v2978_v50, 4  ;;  %v1095_v58 = vrot.slane %v2978_v50, 6  ;;  %v2126_v51 = vld [vmem:[#allocation17 + $0x78] sm:$0xff]  }
 0x972   :  { %v1176_v12 = vrot.slane %v2978_v50, 7  ;;  %v1321_v28 = vrot.slane %v2978_v50, 1  ;;  %v1402_v38 = vrot.slane %v2978_v50, 2  ;;  %v1483_v41 = vrot.slane %v2978_v50, 3 }
 0x973   :  { %v959_v53 = vrot.slane %v2981_v52, 5  ;;  %v937_v55 = vrot.slane %v2981_v52, 4  ;;  %v1094_v57 = vrot.slane %v2981_v52, 6  ;;  %v1175_v59 = vrot.slane %v2981_v52, 7 }
 0x974   :  { %v1320_v23 = vrot.slane %v2981_v52, 1  ;;  %v1401_v33 = vrot.slane %v2981_v52, 2  ;;  %v1482_v35 = vrot.slane %v2981_v52, 3  ;;  %v1256_v39 = vpack.c.bf16 %v2978_v50, %v2981_v52 }
 0x975   :  { %v962_v60 = vsel %vm961_vm5, %v959_v53, %v960_v54  ;;  %v963_v62 = vsel %vm961_vm5, %v960_v54, %v959_v53  ;;  %v3004_v63 = vsel %vm939_vm7, %v937_v55, %v938_v56  ;;  %v3008_v1 = vsel %vm939_vm7, %v938_v56, %v937_v55  ;;  %v2127_v56 = vld [vmem:[#allocation17 + $0x80] sm:$0xff]  }
 0x976   :  { %v974_v5 = vsel %vm964_vm6, %v963_v62, 0.0  ;;  %v975_v6 = vsel %vm965_vm8, %v962_v60, 0.0  ;;  %v952_v2 = vsel %vm942_vm9, %v3008_v1, 0.0  ;;  %v953_v7 = vsel %vm943_vm10, %v3004_v63, 0.0 }
 0x977   :  { %v976_v9 = vpack.c.bf16 %v975_v6, %v974_v5  ;;  %v954_v10 = vpack.c.bf16 %v953_v7, %v952_v2  ;;  %v1097_v13 = vsel %vm1096_vm11, %v1094_v57, %v1095_v58  ;;  %v1098_v15 = vsel %vm1096_vm11, %v1095_v58, %v1094_v57  ;;  %v2131_v6 = vld [vmem:[#allocation20 + $0x10] sm:$0xff]   ;;  %v2132_v2 = vld [vmem:[#allocation20 + $0x18] sm:$0xff]  }
 0x978   :  { %v1178_v16 = vsel %vm1177_vm12, %v1175_v59, %v1176_v12  ;;  %v1179_v3 = vsel %vm1177_vm12, %v1176_v12, %v1175_v59  ;;  %v1109_v18 = vsel %vm1099_vm13, %v1098_v15, 0.0  ;;  %v1110_v20 = vsel %vm1100_vm14, %v1097_v13, 0.0  ;;  %v2128_v59 = vld [vmem:[#allocation17 + $0x88] sm:$0xff]  }
 0x979   :  { %1992 = vmatmul.mubr.msk.bf16.vlgmr.msra.gmra.mrb[20].mxu0 %vm269_vm1, %v976_v9  ;;  %2000 = vmatmul.mubr.msk.bf16.vlgmr.msra.gmra.mrb[20].mxu1 %vm269_vm1, %v954_v10  ;;  %v1190_v21 = vsel %vm1180_vm15, %v1179_v3, 0.0  ;;  %v1191_v22 = vsel %vm1181_vm2, %v1178_v16, 0.0  ;;  %v1111_v26 = vpack.c.bf16 %v1110_v20, %v1109_v18  ;;  %v1323_v29 = vsel %vm1322_vm3, %v1320_v23, %v1321_v28 }
 0x97a   :  { %2004 = vmatpush3.bf16.msra.mxu0 %v2115_v61  ;;  %2012 = vmatpush3.bf16.msra.mxu1 %v2116_v8  ;;  %v1192_v27 = vpack.c.bf16 %v1191_v22, %v1190_v21  ;;  %v1324_v24 = vsel %vm1322_vm3, %v1321_v28, %v1320_v23  ;;  %vm1328_vm5 = vcmp.lt.s32.totalorder %v2975_v49, 7  ;;  %v1335_v32 = vsel %vm1327_vm4, %v1323_v29, 0.0 }
 0x97b   :  { %2005 = vmatprep.subr.bf16.mxu0 %v2548_v0  ;;  %2013 = vmatprep.subr.bf16.mxu1 %v2548_v0  ;;  %v1336_v14 = vsel %vm1328_vm5, %v1324_v24, 0.0  ;;  %vm1403_vm6 = vcmp.lt.s32.totalorder %v2965_v34, 6  ;;  %vm1484_vm7 = vcmp.lt.s32.totalorder %v2965_v34, 5  ;;  %vm1408_vm8 = vcmp.lt.s32.totalorder %v2971_v47, 6 }
 0x97c   :  { %2007 = vmatprep.mubr.msk.bf16.mxu0 %vm2549_vm0, %v2548_v0  ;;  %2015 = vmatprep.mubr.msk.bf16.mxu1 %vm2549_vm0, %v2548_v0  ;;  %v1337_v40 = vpack.c.bf16 %v1336_v14, %v1335_v32  ;;  %v1404_v11 = vsel %vm1403_vm6, %v1401_v33, %v1402_v38  ;;  %vm1409_vm9 = vcmp.lt.s32.totalorder %v2975_v49, 6  ;;  %vm1489_vm10 = vcmp.lt.s32.totalorder %v2971_v47, 5 }
 0x97d   :  { %v1405_v42 = vsel %vm1403_vm6, %v1402_v38, %v1401_v33  ;;  %v1485_v43 = vsel %vm1484_vm7, %v1482_v35, %v1483_v41  ;;  %v1486_v45 = vsel %vm1484_vm7, %v1483_v41, %v1482_v35  ;;  %vm1490_vm11 = vcmp.lt.s32.totalorder %v2975_v49, 5 }
 0x97e   :  { %2006 = vmatpush3.bf16.msra.mxu0 %v2117_v17  ;;  %2014 = vmatpush3.bf16.msra.mxu1 %v2118_v4  ;;  %v1416_v34 = vsel %vm1408_vm8, %v1404_v11, 0.0  ;;  %v1417_v53 = vsel %vm1409_vm9, %v1405_v42, 0.0  ;;  %v1497_v54 = vsel %vm1489_vm10, %v1485_v43, 0.0  ;;  %v1498_v55 = vsel %vm1490_vm11, %v1486_v45, 0.0 }
 0x97f   :  { %2019 = vmatprep.subr.bf16.mxu0 %v2548_v0  ;;  %2027 = vmatprep.subr.bf16.mxu1 %v2548_v0  ;;  %v1418_v57 = vpack.c.bf16 %v1417_v53, %v1416_v34  ;;  %v1499_v58 = vpack.c.bf16 %v1498_v55, %v1497_v54  ;;  %vm1565_vm12 = vcmp.lt.s32.totalorder %v2971_v47, 4  ;;  %vm1566_vm13 = vcmp.lt.s32.totalorder %v2975_v49, 4  ;;  %v2129_v47 = vld [vmem:[#allocation20] sm:$0xff]   ;;  %v2130_v49 = vld [vmem:[#allocation20 + $0x8] sm:$0xff]   ;;  %v1860_v54 = vld [vmem:[#allocation19] ss:$0 sm:$0xff] }
 0x980   :  { %v1573_v60 = vsel %vm1565_vm12, %v3004_v63, 0.0  ;;  %v1574_v62 = vsel %vm1566_vm13, %v3008_v1, 0.0 }
 0x981   :  { %2008 = vmatmul.mubr.msk.bf16.vlgmr.msra.gmra.mrb[24].mxu0 %vm269_vm1, %v1111_v26  ;;  %2016 = vmatmul.mubr.msk.bf16.vlgmr.msra.gmra.mrb[24].mxu1 %vm269_vm1, %v1192_v27  ;;  %v1575_v5 = vpack.c.bf16 %v1574_v62, %v1573_v60 }
 0x982   :  { %2020 = vmatpush3.bf16.msra.mxu0 %v2119_v19  ;;  %2028 = vmatpush3.bf16.msra.mxu1 %v2120_v25 }
 0x983   :  { %2021 = vmatprep.subr.bf16.mxu0 %v2548_v0  ;;  %2029 = vmatprep.subr.bf16.mxu1 %v2548_v0 }
 0x984   :  { %2023 = vmatprep.mubr.msk.bf16.mxu0 %vm2549_vm0, %v2548_v0  ;;  %2031 = vmatprep.mubr.msk.bf16.mxu1 %vm2549_vm0, %v2548_v0 }
 0x986   :  { %2022 = vmatpush3.bf16.msra.mxu0 %v2121_v30  ;;  %2030 = vmatpush3.bf16.msra.mxu1 %v2122_v31 }
 0x987   :  { %2035 = vmatprep.subr.bf16.mxu0 %v2548_v0  ;;  %2043 = vmatprep.subr.bf16.mxu1 %v2548_v0 }
 0x989   :  { %2024 = vmatmul.mubr.msk.bf16.vlgmr.msra.gmra.mrb[28].mxu0 %vm269_vm1, %v1256_v39  ;;  %2032 = vmatmul.mubr.msk.bf16.vlgmr.msra.gmra.mrb[28].mxu1 %vm269_vm1, %v1337_v40 }
 0x98a   :  { %2036 = vmatpush3.bf16.msra.mxu0 %v2123_v36  ;;  %2044 = vmatpush3.bf16.msra.mxu1 %v2124_v37 }
 0x98b   :  { %2037 = vmatprep.subr.bf16.mxu0 %v2548_v0  ;;  %2045 = vmatprep.subr.bf16.mxu1 %v2548_v0 }
 0x98c   :  { %2039 = vmatprep.mubr.msk.bf16.mxu0 %vm2549_vm0, %v2548_v0  ;;  %2047 = vmatprep.mubr.msk.bf16.mxu1 %vm2549_vm0, %v2548_v0 }
 0x98e   :  { %2038 = vmatpush3.bf16.msra.mxu0 %v2125_v46  ;;  %2046 = vmatpush3.bf16.msra.mxu1 %v2126_v51 }
 0x98f   :  { %2051 = vmatprep.subr.bf16.mxu0 %v2548_v0  ;;  %2059 = vmatprep.subr.bf16.mxu1 %v2548_v0 }
 0x991   :  { %2040 = vmatmul.mubr.msk.bf16.vlgmr.msra.gmra.mrb[32].mxu0 %vm269_vm1, %v1418_v57  ;;  %2048 = vmatmul.mubr.msk.bf16.vlgmr.msra.gmra.mrb[32].mxu1 %vm269_vm1, %v1499_v58 }
 0x992   :  { %2052 = vmatpush3.bf16.msra.mxu0 %v2127_v56  ;;  %2055 = vmatprep.mubr.msk.bf16.mxu0 %vm2549_vm0, %v2548_v0 }
 0x993   :  { %2053 = vmatprep.subr.bf16.mxu0 %v2548_v0  ;;  %2067 = vmatprep.mubr.msk.bf16.mxu1 %vm2549_vm0, %v2548_v0  ;;  %vm1690_vm0 = vcmask 523264  }
 0x994   :  { %2060 = vmatpush3.bf16.msra.mxu1 %v2129_v47 }
 0x995   :  { %2061 = vmatprep.subr.bf16.mxu1 %v2548_v0 }
 0x996   :  { %2054 = vmatpush3.bf16.msra.mxu0 %v2128_v59 }
 0x998   :  { %2062 = vmatpush3.bf16.msra.mxu1 %v2130_v49 }
 0x999   :  { %2056 = vmatmul.mubr.msk.bf16.vlgmr.msra.gmra.mrb[36].mxu0 %vm269_vm1, %v1575_v5  ;;  %2063 = vmatprep.subr.bf16.mxu1 %v2548_v0 }
 0x99c   :  { %2064 = vmatpush3.bf16.msra.mxu1 %v2131_v6  ;;  %v1861_v6 = vld [vmem:[#allocation22] ss:$0 sm:$0xff] }
 0x99d   :  { %2065 = vmatprep.subr.bf16.mxu1 %v2548_v0 }
 0x9a0   :  { %2066 = vmatpush3.bf16.msra.mxu1 %v2132_v2 }
 0xa4c   :  { %v1031_v63 = vpop.f32.mrb[20].mxu0  ;;  %v1087_v1 = vpop.f32.mrb[20].mxu1 }
 0xa4d   :  { %v1088_v7 = vadd.f32 %v1087_v1, %v1031_v63  ;;  %v1993_v61 = vpop.f32.mrb[21].mxu0  ;;  %v2001_v8 = vpop.f32.mrb[21].mxu1 }
 0xa4e   :  { %v1034_v9 = vpop.f32.mrb[22].mxu0  ;;  %v1090_v10 = vpop.f32.mrb[22].mxu1 }
 0xa4f   :  { %v1091_v12 = vadd.f32 %v1090_v10, %v1034_v9  ;;  %v1994_v13 = vpop.f32.mrb[23].mxu0  ;;  %v2002_v15 = vpop.f32.mrb[23].mxu1 }
 0xa54   :  { %v1166_v16 = vpop.f32.mrb[24].mxu0  ;;  %v1247_v3 = vpop.f32.mrb[24].mxu1 }
 0xa55   :  { %v1173_v17 = vadd.f32 %v1166_v16, %v1088_v7  ;;  %v2009_v4 = vpop.f32.mrb[25].mxu0  ;;  %v2017_v18 = vpop.f32.mrb[25].mxu1 }
 0xa56   :  { %v1169_v20 = vpop.f32.mrb[26].mxu0  ;;  %v1250_v21 = vpop.f32.mrb[26].mxu1 }
 0xa57   :  { %v1254_v22 = vadd.f32 %v1247_v3, %v1173_v17  ;;  %v1174_v0 = vadd.f32 %v1169_v20, %v1091_v12  ;;  %v2010_v23 = vpop.f32.mrb[27].mxu0  ;;  %v2018_v19 = vpop.f32.mrb[27].mxu1 }
 0xa59   :  { %v1255_v25 = vadd.f32 %v1250_v21, %v1174_v0 }
 0xa5c   :  { %v1311_v26 = vpop.f32.mrb[28].mxu0  ;;  %v1392_v27 = vpop.f32.mrb[28].mxu1 }
 0xa5d   :  { %v1318_v28 = vadd.f32 %v1311_v26, %v1254_v22  ;;  %v2025_v29 = vpop.f32.mrb[29].mxu0  ;;  %v2033_v24 = vpop.f32.mrb[29].mxu1 }
 0xa5e   :  { %v1314_v30 = vpop.f32.mrb[30].mxu0  ;;  %v1395_v31 = vpop.f32.mrb[30].mxu1 }
 0xa5f   :  { %v1399_v32 = vadd.f32 %v1392_v27, %v1318_v28  ;;  %v1319_v14 = vadd.f32 %v1314_v30, %v1255_v25  ;;  %v2026_v33 = vpop.f32.mrb[31].mxu0  ;;  %v2034_v35 = vpop.f32.mrb[31].mxu1  ;;  %v1867_v30 = vld [vmem:[#allocation23] ss:$0 sm:$0xff] }
 0xa61   :  { %v1400_v36 = vadd.f32 %v1395_v31, %v1319_v14 }
 0xa64   :  { %v1473_v37 = vpop.f32.mrb[32].mxu0  ;;  %v1554_v38 = vpop.f32.mrb[32].mxu1 }
 0xa65   :  { %v1480_v39 = vadd.f32 %v1473_v37, %v1399_v32  ;;  %v2041_v40 = vpop.f32.mrb[33].mxu0  ;;  %v2049_v41 = vpop.f32.mrb[33].mxu1  ;;  %v1868_v32 = vld [vmem:[#allocation25] ss:$0 sm:$0xff] }
 0xa66   :  { %v1476_v11 = vpop.f32.mrb[34].mxu0  ;;  %v1557_v42 = vpop.f32.mrb[34].mxu1 }
 0xa67   :  { %v1561_v43 = vadd.f32 %v1554_v38, %v1480_v39  ;;  %v1481_v45 = vadd.f32 %v1476_v11, %v1400_v36  ;;  %v2042_v46 = vpop.f32.mrb[35].mxu0  ;;  %v2050_v51 = vpop.f32.mrb[35].mxu1 }
 0xa69   :  { %v1562_v34 = vadd.f32 %v1557_v42, %v1481_v45 }
 0xa6c   :  { %v1630_v53 = vpop.f32.mrb[36].mxu0 }
 0xa6d   :  { %v1637_v55 = vadd.f32 %v1630_v53, %v1561_v43  ;;  %v2057_v56 = vpop.f32.mrb[37].mxu0 }
 0xa6e   :  { %v1633_v57 = vpop.f32.mrb[38].mxu0 }
 0xa6f   :  { %v1646_v58 = vadd.f32 %v1860_v54, %v1637_v55  ;;  %v1638_v59 = vadd.f32 %v1633_v57, %v1562_v34  ;;  %v2058_v60 = vpop.f32.mrb[39].mxu0 }
 0xa71   :  { %v1647_v62 = vadd.f32 %v1860_v54, %v1638_v59  ;;  %v1648_v5 = vmax.f32 %v1646_v58, 0.0 }
 0xa73   :  { %v1649_v47 = vmax.f32 %v1647_v62, 0.0 }
 0xa75   :  { %v1650_v49 = vpack.c.bf16 %v1649_v47, %v1648_v5 }
 0xa77   :  { %2068 = vmatmul.mubr.msk.bf16.vlgmr.msra.gmra.mrb[36].mxu1 %vm1690_vm0, %v1650_v49 }
 0xb4a   :  { %v1728_v2 = vpop.f32.mrb[36].mxu1 }
 0xb4b   :  { %v1729_v63 = vadd.f32 %v1861_v6, %v1728_v2  ;;  %v2069_v1 = vpop.f32.mrb[37].mxu1 }
 0xb4c   :  { %v1731_v7 = vpop.f32.mrb[38].mxu1 }
 0xb4d   :  { %v1735_v61 = vadd.f32 %v1729_v63, %v2981_v52  ;;  %v1732_v8 = vadd.f32 %v1861_v6, %v1731_v7  ;;  %v2070_v9 = vpop.f32.mrb[39].mxu1 }
 0xb4f   :  { %v1736_v10 = vadd.f32 %v1732_v8, %v2978_v50  ;;  %v1739_v12 = vsel %vm269_vm1, %v1735_v61, 0.0  ;;  %v1747_v13 = vmul.f32 %v1735_v61, %v1735_v61 }
 0xb50   :  { %1740 = vadd.xlane.f32.xlu1 %v1739_v12 }
 0xb51   :  { %v1742_v15 = vsel %vm269_vm1, %v1736_v10, 0.0  ;;  %v1749_v16 = vsel %vm269_vm1, %v1747_v13, 0.0  ;;  %v1748_v3 = vmul.f32 %v1736_v10, %v1736_v10 }
 0xb52   :  { %1743 = vadd.xlane.f32.xlu0 %v1742_v15 }
 0xb53   :  { %v1752_v17 = vsel %vm269_vm1, %v1748_v3, 0.0 }
 0xb54   :  { %1750 = vadd.xlane.f32.xlu1 %v1749_v16 }
 0xb58   :  { %1753 = vadd.xlane.f32.xlu1 %v1752_v17 }
 0xbdd   :  { %v1741_v4 = vpop.xlane.xlu1 %1740 }
 0xbde   :  { %v1745_v52 = vmul.f32 0.03125, %v1741_v4 }
 0xbdf   :  { %v1744_v18 = vpop.xlane.xlu0 %1743 }
 0xbe0   :  { %v1757_v21 = vmul.f32 %v1745_v52, %v1745_v52  ;;  %v1746_v50 = vmul.f32 0.03125, %v1744_v18  ;;  %v1761_v29 = vsub.f32 %v1735_v61, %v1745_v52 }
 0xbe1   :  { %v1751_v20 = vpop.xlane.xlu1 %1750 }
 0xbe2   :  { %v1755_v22 = vmul.f32 0.03125, %v1751_v20  ;;  %v1758_v19 = vmul.f32 %v1746_v50, %v1746_v50  ;;  %v1762_v14 = vsub.f32 %v1736_v10, %v1746_v50 }
 0xbe4   :  { %v1759_v0 = vsub.f32 %v1755_v22, %v1757_v21 }
 0xbe5   :  { %v1754_v23 = vpop.xlane.xlu1 %1753 }
 0xbe6   :  { %v1763_v25 = vadd.f32 1e-05, %v1759_v0  ;;  %v1756_v26 = vmul.f32 0.03125, %v1754_v23 }
 0xbe8   :  { %2153 = vrsqrt.f32 %v1763_v25  ;;  %v1760_v27 = vsub.f32 %v1756_v26, %v1758_v19 }
 0xbea   :  { %v1764_v28 = vadd.f32 1e-05, %v1760_v27 }
 0xbec   :  { %2155 = vrsqrt.f32 %v1764_v28 }
 0xbf2   :  { %v2154_v24 = vpop.eup %2153 }
 0xbf3   :  { %v1767_v31 = vmul.f32 %v2154_v24, %v1761_v29 }
 0xbf5   :  { %v1775_v33 = vmul.f32 %v1867_v30, %v1767_v31 }
 0xbf6   :  { %v2156_v35 = vpop.eup %2155 }
 0xbf7   :  { %v1768_v36 = vmul.f32 %v2156_v35, %v1762_v14  ;;  %v1783_v37 = vadd.f32 %v1868_v32, %v1775_v33 }
 0xbf9   :  { %v1776_v38 = vmul.f32 %v1867_v30, %v1768_v36  ;;  %v1785_v39 = vmul.f32 %v1783_v37, %v2973_v48 }
 0xbfb   :  { %v1784_v40 = vadd.f32 %v1868_v32, %v1776_v38  ;;  %1787 = vst.msk [vmem:[#allocation26] sm:$0xff] %vm269_vm1, %v1785_v39 }
 0xbfd   :  { %v1786_v41 = vmul.f32 %v1784_v40, %v2968_v44 }
 0xbff   :  { %1788 = vst.msk [vmem:[#allocation26 + $0x8] sm:$0xff] %vm269_vm1, %v1786_v41 }
 0xc00   :  { %2498 = shalt.err (!%p2495_p12)
}
 0xc01   :  { %s2499_s18 = scalar_lea.hbm %s3151_s15, 256 }
 0xc02   :  { %p2500_p13 = scmp.ne.s32.totalorder %s3151_s15, %s2499_s18  ;;  %p2503_p0 = scmp.lt.u32.totalorder %s2499_s18, %s3151_s15 }
 0xc04   :  { %p2505_p1 = pnand %p2503_p0, %p2500_p13 }
 0xc06   :  { %2508 = shalt.err (!%p2505_p1)
}
 0xc07   :  { %1800 = dma.vmem_to_hbm [thread:$0]  %s1795_s11, 256, %s3151_s15, [#allocation4], %s2539_s13, %s2539_s13, %s2540_s22  }
 0xc08   :  { %2525 = dma.done.wait [#allocation4], 256  }
 0xc09   :  { %2526 = vsyncadd [#allocation4], 4294967040 }
 0xc0a   :  { %1804 = vsyncpa [#allocation3], 1 }
 0xc0b   :  { %1805 = vsyncpa [#allocation6], 1 }
 0xc0c   :  { %1806 = vsyncpa [#allocation9], 1 }
 0xc0d   :  { %1807 = vsyncpa [#allocation12], 1 }
 0xc0e   :  { %1808 = vsyncpa [#allocation15], 1 }
 0xc0f   :  { %1809 = vsyncpa [#allocation18], 1 }
 0xc10   :  { %1810 = vsyncpa [#allocation21], 1 }
 0xc11   :  { %1811 = vsyncpa [#allocation24], 1 }
 0xc12   :  { %1812 = vsyncpa [#allocation4], 1 }

</bundles_post_ra>
